<compile_context>
chip_gen: v7x
topology: tpu7x:2x2x1
jax: 0.10.0
libtpu: 0.0.40
codegen_flags: <defaults>
</compile_context>

<pallas_src>
import functools

import jax
import jax.numpy as jnp
from jax.experimental import pallas as pl
from jax.experimental.pallas import tpu as pltpu


_MIB = 1024 * 1024
_PREP_ORDER = ("ln1_g", "ln1_b", "wq", "bq", "wkv", "bkv", "wo", "bo",
               "ln2_g", "ln2_b", "w1", "b1", "w2", "b2")


# ----------------------------- hardware heuristics ---------------------------
def _tpu_info():
    """Returns (vmem_capacity_bytes, bf16_transcendentals_ok) with fallbacks."""
    kind = ""
    try:
        kind = jax.devices()[0].device_kind.lower()
    except Exception:
        pass
    cap = None
    try:
        cap = getattr(pltpu.get_tpu_info(), "vmem_capacity_bytes", None)
    except Exception:
        cap = None
    if cap is None:
        cap = 64 * _MIB if "v7" in kind else 128 * _MIB
    # bf16 EUP/VPU exist on v6e / v7x; v5e and older must use fp32 transcendentals.
    use_bf16_eup = ("v6" in kind) or ("v7" in kind)
    return cap, use_bf16_eup


def _choose_q_tile(S, vmem_cap):
    """q-tile size and padded sequence length."""
    target = 128 if vmem_cap <= 64 * _MIB else 256   # v7x: 64 MiB VMEM -> tq=128
    if S <= target:
        tq = max(8, ((S + 7) // 8) * 8)              # small S: one sublane-aligned tile
        return tq, tq
    best = None
    for t in (target, 128):                          # pick tile with least padding
        s_pad = ((S + t - 1) // t) * t
        if best is None or s_pad < best[1]:
            best = (t, s_pad)
    return best


def _buffered1(shape, index_map):
    """Full-block spec, single-buffered when supported (constant / per-batch index)."""
    if hasattr(pl, "Buffered"):
        try:
            return pl.BlockSpec(shape, index_map, pipeline_mode=pl.Buffered(1))
        except TypeError:
            pass
    return pl.BlockSpec(shape, index_map)


# --------------------------------- kernel ------------------------------------
def _layer_norm(v, g, b, eps):
    # One-pass statistics (E[x], E[x^2]) -> single pair of XLU reductions.
    mu = jnp.mean(v, axis=-1, keepdims=True)
    ms = jnp.mean(v * v, axis=-1, keepdims=True)
    var = ms - mu * mu
    return (v - mu) * jax.lax.rsqrt(var + eps) * g + b


def _encoder_layer_kernel(x_ref,
                          ln1g_ref, ln1b_ref,
                          wq_ref, bq_ref, wkv_ref, bkv_ref,
                          wo_ref, bo_ref,
                          ln2g_ref, ln2b_ref,
                          w1_ref, b1_ref, w2_ref, b2_ref,
                          out_ref,
                          k_scratch, v_scratch,
                          *, eps, seq_len, tq, use_bf16_eup):
    qi = pl.program_id(1)
    f32 = jnp.float32
    bf16 = jnp.bfloat16

    S_pad, H, hd = k_scratch.shape
    D = H * hd

    # ---- K / V for the whole (padded) sequence: computed once per batch
    #      element (first q-tile), stored head-split, reused by later q-tiles.
    @pl.when(qi == 0)
    def _():
        hf = _layer_norm(x_ref[0], ln1g_ref[...], ln1b_ref[...], eps).astype(bf16)
        kv = jnp.dot(hf, wkv_ref[...], preferred_element_type=f32) + bkv_ref[...]
        k_scratch[...] = kv[:, :D].astype(bf16).reshape(S_pad, H, hd)
        v_scratch[...] = kv[:, D:].astype(bf16).reshape(S_pad, H, hd)

    q_start = pl.multiple_of(qi * tq, tq)
    x = x_ref[0, pl.ds(q_start, tq), :]                 # (tq, D) fp32 residual

    # ---- LayerNorm 1 + self-attention ----
    h1 = _layer_norm(x, ln1g_ref[...], ln1b_ref[...], eps)
    # 1/sqrt(head_dim) is pre-folded into wq / bq on the host.
    q = jnp.dot(h1.astype(bf16), wq_ref[...], preferred_element_type=f32) + bq_ref[...]
    qh = q.astype(bf16).reshape(tq, H, hd)
    kh = k_scratch[...]
    vh = v_scratch[...]

    scores = jnp.einsum('qhd,khd->hqk', qh, kh, preferred_element_type=f32)
    if S_pad > seq_len:                                  # mask padded keys
        kpos = jax.lax.broadcasted_iota(jnp.int32, (1, 1, S_pad), 2)
        scores = jnp.where(kpos < seq_len, scores, f32(-1e30))

    m = jnp.max(scores, axis=-1, keepdims=True)
    s = scores - m
    if use_bf16_eup:                                     # bf16 EUP on v6e / v7x
        p = jnp.exp(s.astype(bf16))
        denom = jnp.sum(p, axis=-1, keepdims=True, dtype=f32)
    else:                                                # v5e: fp32 transcendentals
        p = jnp.exp(s)
        denom = jnp.sum(p, axis=-1, keepdims=True)
        p = p.astype(bf16)

    # Unnormalized PV matmul; normalize afterwards (tq*D muls, not H*tq*S).
    attn = jnp.einsum('hqk,khd->qhd', p, vh, preferred_element_type=f32)
    inv = pl.reciprocal(denom, approx=True)              # (H, tq, 1), denom >= 1
    attn = attn * jnp.swapaxes(inv, 0, 1)                # (tq, H, hd) fp32
    attn = attn.reshape(tq, D)
    attn = jnp.dot(attn.astype(bf16), wo_ref[...],
                   preferred_element_type=f32) + bo_ref[...]

    x1 = x + attn                                        # residual 1 (fp32)

    # ---- LayerNorm 2 + MLP (tanh GELU) ----
    h2 = _layer_norm(x1, ln2g_ref[...], ln2b_ref[...], eps)
    h = jnp.dot(h2.astype(bf16), w1_ref[...], preferred_element_type=f32) + b1_ref[...]
    c = 0.7978845608028654                               # sqrt(2/pi)
    if use_bf16_eup:
        hb = h.astype(bf16)
        t = jnp.tanh(c * (hb + 0.044715 * hb * hb * hb))
        h = 0.5 * h * (1.0 + t.astype(f32))
    else:
        h = 0.5 * h * (1.0 + jnp.tanh(c * (h + 0.044715 * h * h * h)))
    # TODO(synk): for production SigLIP sizes on v7x, tile w1/w2 over the
    # intermediate dim (pltpu.emit_pipeline streaming chunks from HBM) instead
    # of keeping them fully VMEM-resident.
    h = jnp.dot(h.astype(bf16), w2_ref[...], preferred_element_type=f32) + b2_ref[...]

    out_ref[0] = x1 + h                                  # residual 2, lane-dense


# ------------------------------ host wrappers --------------------------------
def prepare_layer_params(params, *, num_heads):
    """One-time host prep: bf16 weight casts, scale folded into q-proj, fused K/V."""
    f32, bf16 = jnp.float32, jnp.bfloat16
    D = params["wq"].shape[0]
    hd = D // num_heads
    scale = jnp.asarray(hd ** -0.5, f32)
    row = lambda v: jnp.asarray(v, f32).reshape(1, -1)
    return {
        "ln1_g": row(params["ln1_g"]), "ln1_b": row(params["ln1_b"]),
        "wq": (jnp.asarray(params["wq"], f32) * scale).astype(bf16),
        "bq": row(params["bq"]) * scale,
        "wkv": jnp.concatenate([jnp.asarray(params["wk"], f32),
                                jnp.asarray(params["wv"], f32)], axis=1).astype(bf16),
        "bkv": jnp.concatenate([row(params["bk"]), row(params["bv"])], axis=1),
        "wo": jnp.asarray(params["wo"], f32).astype(bf16), "bo": row(params["bo"]),
        "ln2_g": row(params["ln2_g"]), "ln2_b": row(params["ln2_b"]),
        "w1": jnp.asarray(params["w1"], f32).astype(bf16), "b1": row(params["b1"]),
        "w2": jnp.asarray(params["w2"], f32).astype(bf16), "b2": row(params["b2"]),
    }


def siglip_encoder_layer_pallas(x_padded, prep, *, num_heads, eps, seq_len,
                                tq, vmem_limit, use_bf16_eup):
    B, S_pad, D = x_padded.shape
    nq = S_pad // tq
    hd = D // num_heads

    kernel = functools.partial(_encoder_layer_kernel, eps=eps, seq_len=seq_len,
                               tq=tq, use_bf16_eup=use_bf16_eup)

    args = [x_padded]
    in_specs = [_buffered1((1, S_pad, D), lambda b, q: (b, 0, 0))]
    for name in _PREP_ORDER:
        p = prep[name]
        args.append(p)
        in_specs.append(_buffered1(p.shape, lambda b, q, _n=p.ndim: (0,) * _n))

    # TODO(synk): for B=1 on v7x, move the K/V+LN1 projection into its own small
    # pallas_call so the q-tile axis can be marked "parallel" across both TCs.
    return pl.pallas_call(
        kernel,
        out_shape=jax.ShapeDtypeStruct((B, S_pad, D), jnp.float32),
        grid=(B, nq),
        in_specs=in_specs,
        out_specs=pl.BlockSpec((1, tq, D), lambda b, q: (b, q, 0)),
        scratch_shapes=[pltpu.VMEM((S_pad, num_heads, hd), jnp.bfloat16),  # K
                        pltpu.VMEM((S_pad, num_heads, hd), jnp.bfloat16)], # V
        compiler_params=pltpu.CompilerParams(
            dimension_semantics=("parallel", "arbitrary"),
            vmem_limit_bytes=vmem_limit),
    )(*args)


def siglip_encoder_pallas(x, layer_params, *, num_heads, eps):
    B, S, D = x.shape
    vmem_cap, use_bf16_eup = _tpu_info()
    tq, S_pad = _choose_q_tile(S, vmem_cap)
    vmem_limit = int(max(32 * _MIB, vmem_cap - 20 * _MIB))

    # Hoisted per-forward param prep (cast once, not per pallas_call).
    prepared = [prepare_layer_params(p, num_heads=num_heads) for p in layer_params]

    h = x if S_pad == S else jnp.pad(x, ((0, 0), (0, S_pad - S), (0, 0)))
    # TODO(synk): cross-pallas_call weight prefetch (P10) to hide the next
    # layer's weight DMA behind the current layer's compute.
    for prep in prepared:
        h = siglip_encoder_layer_pallas(h, prep, num_heads=num_heads, eps=eps,
                                        seq_len=S, tq=tq, vmem_limit=vmem_limit,
                                        use_bf16_eup=use_bf16_eup)
    return h if S_pad == S else h[:, :S, :]


# ----------------------------- pure-JAX reference ----------------------------
def _ref_layer(x, p, num_heads, eps):
    B, S, D = x.shape
    hd = D // num_heads

    def ln(v, g, b):
        mu = v.mean(-1, keepdims=True)
        var = ((v - mu) ** 2).mean(-1, keepdims=True)
        return (v - mu) / jnp.sqrt(var + eps) * g + b

    h = ln(x, p["ln1_g"], p["ln1_b"])
    q = h @ p["wq"] + p["bq"]
    k = h @ p["wk"] + p["bk"]
    v = h @ p["wv"] + p["bv"]
    q = q.reshape(B, S, num_heads, hd).transpose(0, 2, 1, 3)
    k = k.reshape(B, S, num_heads, hd).transpose(0, 2, 1, 3)
    v = v.reshape(B, S, num_heads, hd).transpose(0, 2, 1, 3)
    scores = (q @ k.transpose(0, 1, 3, 2)) * (hd ** -0.5)
    w = jax.nn.softmax(scores.astype(jnp.float32), axis=-1)
    a = (w @ v).transpose(0, 2, 1, 3).reshape(B, S, D)
    a = a @ p["wo"] + p["bo"]
    x = x + a
    h = ln(x, p["ln2_g"], p["ln2_b"])
    h = h @ p["w1"] + p["b1"]
    h = jax.nn.gelu(h, approximate=True)
    h = h @ p["w2"] + p["b2"]
    return x + h


def _ref_encoder(x, layer_params, num_heads, eps):
    h = x
    for p in layer_params:
        h = _ref_layer(h, p, num_heads, eps)
    return h


# ------------------------------ parameter init -------------------------------
def init_layer_params(key, hidden, intermediate):
    ks = jax.random.split(key, 8)
    s = 0.02
    return {
        "ln1_g": jnp.ones((1, hidden), jnp.float32),
        "ln1_b": jnp.zeros((1, hidden), jnp.float32),
        "wq": s * jax.random.normal(ks[0], (hidden, hidden), jnp.float32),
        "bq": s * jax.random.normal(ks[1], (1, hidden), jnp.float32),
        "wk": s * jax.random.normal(ks[2], (hidden, hidden), jnp.float32),
        "bk": jnp.zeros((1, hidden), jnp.float32),
        "wv": s * jax.random.normal(ks[3], (hidden, hidden), jnp.float32),
        "bv": jnp.zeros((1, hidden), jnp.float32),
        "wo": s * jax.random.normal(ks[4], (hidden, hidden), jnp.float32),
        "bo": s * jax.random.normal(ks[5], (1, hidden), jnp.float32),
        "ln2_g": jnp.ones((1, hidden), jnp.float32),
        "ln2_b": jnp.zeros((1, hidden), jnp.float32),
        "w1": s * jax.random.normal(ks[6], (hidden, intermediate), jnp.float32),
        "b1": jnp.zeros((1, intermediate), jnp.float32),
        "w2": s * jax.random.normal(ks[7], (intermediate, hidden), jnp.float32),
        "b2": jnp.zeros((1, hidden), jnp.float32),
    }


if __name__ == "__main__":
    # Small SiglipVisionConfig-like settings.
    B, S = 2, 8                  # batch, num_image_tokens (seq)
    hidden_size = 32
    intermediate_size = 64
    num_attention_heads = 4
    num_hidden_layers = 2
    layer_norm_eps = 1e-6

    key = jax.random.PRNGKey(0)
    kx, *layer_keys = jax.random.split(key, 1 + num_hidden_layers)

    inputs_embeds = jax.random.normal(kx, (B, S, hidden_size), jnp.float32)
    layer_params = [init_layer_params(k, hidden_size, intermediate_size)
                    for k in layer_keys]

    out = siglip_encoder_pallas(inputs_embeds, layer_params,
                                num_heads=num_attention_heads,
                                eps=layer_norm_eps)
    out = jax.block_until_ready(out)

    ref = _ref_encoder(inputs_embeds, layer_params,
                       num_attention_heads, layer_norm_eps)
    assert out.shape == (B, S, hidden_size)
    # bf16 matmul operands / transcendentals + approx reciprocal -> relaxed tol.
    assert jnp.allclose(out, ref, atol=3e-2, rtol=3e-2), \
        f"max diff {jnp.max(jnp.abs(out - ref))}"

    print("KERNEL_OK")
</pallas_src>

<mosaic_0001>
module attributes {stable_mosaic.version = 11 : i64} {
  func.func @_encoder_layer_kernel(%arg0: i32, %arg1: i32, %arg2: memref<1x8x32xf32, #tpu.memory_space<vmem>>, %arg3: memref<1x32xf32, #tpu.memory_space<vmem>>, %arg4: memref<1x32xf32, #tpu.memory_space<vmem>>, %arg5: memref<32x32xbf16, #tpu.memory_space<vmem>>, %arg6: memref<1x32xf32, #tpu.memory_space<vmem>>, %arg7: memref<32x64xbf16, #tpu.memory_space<vmem>>, %arg8: memref<1x64xf32, #tpu.memory_space<vmem>>, %arg9: memref<32x32xbf16, #tpu.memory_space<vmem>>, %arg10: memref<1x32xf32, #tpu.memory_space<vmem>>, %arg11: memref<1x32xf32, #tpu.memory_space<vmem>>, %arg12: memref<1x32xf32, #tpu.memory_space<vmem>>, %arg13: memref<32x64xbf16, #tpu.memory_space<vmem>>, %arg14: memref<1x64xf32, #tpu.memory_space<vmem>>, %arg15: memref<64x32xbf16, #tpu.memory_space<vmem>>, %arg16: memref<1x32xf32, #tpu.memory_space<vmem>>, %arg17: memref<1x8x32xf32, #tpu.memory_space<vmem>>, %arg18: memref<8x4x8xbf16, #tpu.memory_space<vmem>>, %arg19: memref<8x4x8xbf16, #tpu.memory_space<vmem>>) attributes {dimension_semantics = [#tpu.dimension_semantics<parallel>, #tpu.dimension_semantics<arbitrary>], iteration_bounds = array<i64: 2, 1>, scalar_prefetch = 0 : i64, scratch_operands = 2 : i64, tpu.core_type = #tpu.core_type<tc>, window_params = [{pipeline_mode = #tpu.pipeline_mode<synchronous>, transform_indices = @transform_0, window_bounds = array<i64: 1, 8, 32>}, {pipeline_mode = #tpu.pipeline_mode<synchronous>, transform_indices = @transform_1, window_bounds = array<i64: 1, 32>}, {pipeline_mode = #tpu.pipeline_mode<synchronous>, transform_indices = @transform_2, window_bounds = array<i64: 1, 32>}, {pipeline_mode = #tpu.pipeline_mode<synchronous>, transform_indices = @transform_3, window_bounds = array<i64: 32, 32>}, {pipeline_mode = #tpu.pipeline_mode<synchronous>, transform_indices = @transform_4, window_bounds = array<i64: 1, 32>}, {pipeline_mode = #tpu.pipeline_mode<synchronous>, transform_indices = @transform_5, window_bounds = array<i64: 32, 64>}, {pipeline_mode = #tpu.pipeline_mode<synchronous>, transform_indices = @transform_6, window_bounds = array<i64: 1, 64>}, {pipeline_mode = #tpu.pipeline_mode<synchronous>, transform_indices = @transform_7, window_bounds = array<i64: 32, 32>}, {pipeline_mode = #tpu.pipeline_mode<synchronous>, transform_indices = @transform_8, window_bounds = array<i64: 1, 32>}, {pipeline_mode = #tpu.pipeline_mode<synchronous>, transform_indices = @transform_9, window_bounds = array<i64: 1, 32>}, {pipeline_mode = #tpu.pipeline_mode<synchronous>, transform_indices = @transform_10, window_bounds = array<i64: 1, 32>}, {pipeline_mode = #tpu.pipeline_mode<synchronous>, transform_indices = @transform_11, window_bounds = array<i64: 32, 64>}, {pipeline_mode = #tpu.pipeline_mode<synchronous>, transform_indices = @transform_12, window_bounds = array<i64: 1, 64>}, {pipeline_mode = #tpu.pipeline_mode<synchronous>, transform_indices = @transform_13, window_bounds = array<i64: 64, 32>}, {pipeline_mode = #tpu.pipeline_mode<synchronous>, transform_indices = @transform_14, window_bounds = array<i64: 1, 32>}, {transform_indices = @transform_15, window_bounds = array<i64: 1, 8, 32>}]} {
    %c0_i32 = arith.constant 0 : i32
    %0 = arith.cmpi eq, %arg1, %c0_i32 : i32
    %1 = arith.extui %0 : i1 to i32
    %c0_i32_0 = arith.constant 0 : i32
    %2 = arith.cmpi ne, %1, %c0_i32_0 : i32
    scf.if %2 {
      %c0_56 = arith.constant 0 : index
      %c0_57 = arith.constant 0 : index
      %c0_58 = arith.constant 0 : index
      %118 = vector.load %arg2[%c0_56, %c0_57, %c0_58] : memref<1x8x32xf32, #tpu.memory_space<vmem>>, vector<1x8x32xf32>
      %119 = vector.shape_cast %118 : vector<1x8x32xf32> to vector<8x32xf32>
      %c0_59 = arith.constant 0 : index
      %c0_60 = arith.constant 0 : index
      %120 = vector.load %arg3[%c0_59, %c0_60] : memref<1x32xf32, #tpu.memory_space<vmem>>, vector<1x32xf32>
      %c0_61 = arith.constant 0 : index
      %c0_62 = arith.constant 0 : index
      %121 = vector.load %arg4[%c0_61, %c0_62] : memref<1x32xf32, #tpu.memory_space<vmem>>, vector<1x32xf32>
      %cst_63 = arith.constant dense<0.000000e+00> : vector<8xf32>
      %122 = vector.multi_reduction <add>, %119, %cst_63 [1] : vector<8x32xf32> to vector<8xf32>
      %123 = vector.shape_cast %122 : vector<8xf32> to vector<8x1xf32>
      %cst_64 = arith.constant 3.200000e+01 : f32
      %124 = vector.broadcast %cst_64 : f32 to vector<8x1xf32>
      %125 = arith.divf %123, %124 : vector<8x1xf32>
      %126 = arith.mulf %119, %119 : vector<8x32xf32>
      %cst_65 = arith.constant dense<0.000000e+00> : vector<8xf32>
      %127 = vector.multi_reduction <add>, %126, %cst_65 [1] : vector<8x32xf32> to vector<8xf32>
      %128 = vector.shape_cast %127 : vector<8xf32> to vector<8x1xf32>
      %cst_66 = arith.constant 3.200000e+01 : f32
      %129 = vector.broadcast %cst_66 : f32 to vector<8x1xf32>
      %130 = arith.divf %128, %129 : vector<8x1xf32>
      %131 = arith.mulf %125, %125 : vector<8x1xf32>
      %132 = arith.subf %130, %131 : vector<8x1xf32>
      %133 = vector.broadcast %125 : vector<8x1xf32> to vector<8x32xf32>
      %134 = arith.subf %119, %133 : vector<8x32xf32>
      %cst_67 = arith.constant 9.99999997E-7 : f32
      %135 = vector.broadcast %cst_67 : f32 to vector<8x1xf32>
      %136 = arith.addf %132, %135 : vector<8x1xf32>
      %137 = math.rsqrt %136 : vector<8x1xf32>
      %138 = vector.broadcast %137 : vector<8x1xf32> to vector<8x32xf32>
      %139 = arith.mulf %134, %138 : vector<8x32xf32>
      %140 = vector.broadcast %120 : vector<1x32xf32> to vector<8x32xf32>
      %141 = arith.mulf %139, %140 : vector<8x32xf32>
      %142 = vector.broadcast %121 : vector<1x32xf32> to vector<8x32xf32>
      %143 = arith.addf %141, %142 : vector<8x32xf32>
      %144 = arith.truncf %143 : vector<8x32xf32> to vector<8x32xbf16>
      %c0_68 = arith.constant 0 : index
      %c0_69 = arith.constant 0 : index
      %145 = vector.load %arg7[%c0_68, %c0_69] : memref<32x64xbf16, #tpu.memory_space<vmem>>, vector<32x64xbf16>
      %cst_70 = arith.constant dense<0.000000e+00> : vector<8x64xf32>
      %146 = tpu.matmul %144, %145, %cst_70 {dimension_numbers = #tpu.dot_dimension_numbers<[1], [0], [0], [1], [0, 0, 1, 1], [], []>} : vector<8x32xbf16>, vector<32x64xbf16>, vector<8x64xf32> -> vector<8x64xf32>
      %c0_71 = arith.constant 0 : index
      %c0_72 = arith.constant 0 : index
      %147 = vector.load %arg8[%c0_71, %c0_72] : memref<1x64xf32, #tpu.memory_space<vmem>>, vector<1x64xf32>
      %148 = vector.broadcast %147 : vector<1x64xf32> to vector<8x64xf32>
      %149 = arith.addf %146, %148 : vector<8x64xf32>
      %150 = vector.extract_strided_slice %149 {offsets = [0, 0], sizes = [8, 32], strides = [1, 1]} : vector<8x64xf32> to vector<8x32xf32>
      %151 = arith.truncf %150 : vector<8x32xf32> to vector<8x32xbf16>
      %152 = vector.shape_cast %151 : vector<8x32xbf16> to vector<8x4x8xbf16>
      %c0_73 = arith.constant 0 : index
      %c0_74 = arith.constant 0 : index
      %c0_75 = arith.constant 0 : index
      %153 = vector.load %arg18[%c0_73, %c0_74, %c0_75] : memref<8x4x8xbf16, #tpu.memory_space<vmem>>, vector<8x4x8xbf16>
      tpu.vector_store %arg18[%c0_73, %c0_74, %c0_75], %152 {strides = array<i32>} : memref<8x4x8xbf16, #tpu.memory_space<vmem>>, vector<8x4x8xbf16>,
      %154 = vector.extract_strided_slice %149 {offsets = [0, 32], sizes = [8, 32], strides = [1, 1]} : vector<8x64xf32> to vector<8x32xf32>
      %155 = arith.truncf %154 : vector<8x32xf32> to vector<8x32xbf16>
      %156 = vector.shape_cast %155 : vector<8x32xbf16> to vector<8x4x8xbf16>
      %c0_76 = arith.constant 0 : index
      %c0_77 = arith.constant 0 : index
      %c0_78 = arith.constant 0 : index
      %157 = vector.load %arg19[%c0_76, %c0_77, %c0_78] : memref<8x4x8xbf16, #tpu.memory_space<vmem>>, vector<8x4x8xbf16>
      tpu.vector_store %arg19[%c0_76, %c0_77, %c0_78], %156 {strides = array<i32>} : memref<8x4x8xbf16, #tpu.memory_space<vmem>>, vector<8x4x8xbf16>,
    } else {
    }
    %c8_i32 = arith.constant 8 : i32
    %3 = arith.muli %arg1, %c8_i32 : i32
    %4 = tpu.assume_multiple %3, 8 : i32
    %c0 = arith.constant 0 : index
    %5 = arith.index_cast %4 : i32 to index
    %c0_1 = arith.constant 0 : index
    %6 = vector.load %arg2[%c0, %5, %c0_1] : memref<1x8x32xf32, #tpu.memory_space<vmem>>, vector<1x8x32xf32>
    %7 = vector.shape_cast %6 : vector<1x8x32xf32> to vector<8x32xf32>
    %c0_2 = arith.constant 0 : index
    %c0_3 = arith.constant 0 : index
    %8 = vector.load %arg3[%c0_2, %c0_3] : memref<1x32xf32, #tpu.memory_space<vmem>>, vector<1x32xf32>
    %c0_4 = arith.constant 0 : index
    %c0_5 = arith.constant 0 : index
    %9 = vector.load %arg4[%c0_4, %c0_5] : memref<1x32xf32, #tpu.memory_space<vmem>>, vector<1x32xf32>
    %cst = arith.constant dense<0.000000e+00> : vector<8xf32>
    %10 = vector.multi_reduction <add>, %7, %cst [1] : vector<8x32xf32> to vector<8xf32>
    %11 = vector.shape_cast %10 : vector<8xf32> to vector<8x1xf32>
    %cst_6 = arith.constant 3.200000e+01 : f32
    %12 = vector.broadcast %cst_6 : f32 to vector<8x1xf32>
    %13 = arith.divf %11, %12 : vector<8x1xf32>
    %14 = arith.mulf %7, %7 : vector<8x32xf32>
    %cst_7 = arith.constant dense<0.000000e+00> : vector<8xf32>
    %15 = vector.multi_reduction <add>, %14, %cst_7 [1] : vector<8x32xf32> to vector<8xf32>
    %16 = vector.shape_cast %15 : vector<8xf32> to vector<8x1xf32>
    %cst_8 = arith.constant 3.200000e+01 : f32
    %17 = vector.broadcast %cst_8 : f32 to vector<8x1xf32>
    %18 = arith.divf %16, %17 : vector<8x1xf32>
    %19 = arith.mulf %13, %13 : vector<8x1xf32>
    %20 = arith.subf %18, %19 : vector<8x1xf32>
    %21 = vector.broadcast %13 : vector<8x1xf32> to vector<8x32xf32>
    %22 = arith.subf %7, %21 : vector<8x32xf32>
    %cst_9 = arith.constant 9.99999997E-7 : f32
    %23 = vector.broadcast %cst_9 : f32 to vector<8x1xf32>
    %24 = arith.addf %20, %23 : vector<8x1xf32>
    %25 = math.rsqrt %24 : vector<8x1xf32>
    %26 = vector.broadcast %25 : vector<8x1xf32> to vector<8x32xf32>
    %27 = arith.mulf %22, %26 : vector<8x32xf32>
    %28 = vector.broadcast %8 : vector<1x32xf32> to vector<8x32xf32>
    %29 = arith.mulf %27, %28 : vector<8x32xf32>
    %30 = vector.broadcast %9 : vector<1x32xf32> to vector<8x32xf32>
    %31 = arith.addf %29, %30 : vector<8x32xf32>
    %32 = arith.truncf %31 : vector<8x32xf32> to vector<8x32xbf16>
    %c0_10 = arith.constant 0 : index
    %c0_11 = arith.constant 0 : index
    %33 = vector.load %arg5[%c0_10, %c0_11] : memref<32x32xbf16, #tpu.memory_space<vmem>>, vector<32x32xbf16>
    %cst_12 = arith.constant dense<0.000000e+00> : vector<8x32xf32>
    %34 = tpu.matmul %32, %33, %cst_12 {dimension_numbers = #tpu.dot_dimension_numbers<[1], [0], [0], [1], [0, 0, 1, 1], [], []>} : vector<8x32xbf16>, vector<32x32xbf16>, vector<8x32xf32> -> vector<8x32xf32>
    %c0_13 = arith.constant 0 : index
    %c0_14 = arith.constant 0 : index
    %35 = vector.load %arg6[%c0_13, %c0_14] : memref<1x32xf32, #tpu.memory_space<vmem>>, vector<1x32xf32>
    %36 = vector.broadcast %35 : vector<1x32xf32> to vector<8x32xf32>
    %37 = arith.addf %34, %36 : vector<8x32xf32>
    %38 = arith.truncf %37 : vector<8x32xf32> to vector<8x32xbf16>
    %39 = vector.shape_cast %38 : vector<8x32xbf16> to vector<8x4x8xbf16>
    %c0_15 = arith.constant 0 : index
    %c0_16 = arith.constant 0 : index
    %c0_17 = arith.constant 0 : index
    %40 = vector.load %arg18[%c0_15, %c0_16, %c0_17] : memref<8x4x8xbf16, #tpu.memory_space<vmem>>, vector<8x4x8xbf16>
    %c0_18 = arith.constant 0 : index
    %c0_19 = arith.constant 0 : index
    %c0_20 = arith.constant 0 : index
    %41 = vector.load %arg19[%c0_18, %c0_19, %c0_20] : memref<8x4x8xbf16, #tpu.memory_space<vmem>>, vector<8x4x8xbf16>
    "tpu.trace_start"() <{level = 10 : i32, message = "qhd,khd->hqk"}> : () -> ()
    %cst_21 = arith.constant dense<0.000000e+00> : vector<4x8x8xf32>
    %42 = tpu.matmul %39, %40, %cst_21 {dimension_numbers = #tpu.dot_dimension_numbers<[2], [2], [0], [0], [0, 1, 0, 0, 1, 0], [1], [1]>} : vector<8x4x8xbf16>, vector<8x4x8xbf16>, vector<4x8x8xf32> -> vector<4x8x8xf32>
    "tpu.trace_stop"() : () -> ()
    %cst_22 = arith.constant dense<0xFF800000> : vector<4x8xf32>
    %43 = vector.multi_reduction <maximumf>, %42, %cst_22 [2] : vector<4x8x8xf32> to vector<4x8xf32>
    %44 = vector.shape_cast %43 : vector<4x8xf32> to vector<4x8x1xf32>
    %45 = vector.broadcast %44 : vector<4x8x1xf32> to vector<4x8x8xf32>
    %46 = arith.subf %42, %45 : vector<4x8x8xf32>
    %47 = math.exp %46 : vector<4x8x8xf32>
    %cst_23 = arith.constant dense<0.000000e+00> : vector<4x8xf32>
    %48 = vector.multi_reduction <add>, %47, %cst_23 [2] : vector<4x8x8xf32> to vector<4x8xf32>
    %49 = vector.shape_cast %48 : vector<4x8xf32> to vector<4x8x1xf32>
    %50 = arith.truncf %47 : vector<4x8x8xf32> to vector<4x8x8xbf16>
    "tpu.trace_start"() <{level = 10 : i32, message = "hqk,khd->qhd"}> : () -> ()
    %cst_24 = arith.constant dense<0.000000e+00> : vector<4x8x8xf32>
    %51 = tpu.matmul %41, %50, %cst_24 {dimension_numbers = #tpu.dot_dimension_numbers<[0], [2], [2], [1], [0, 1, 0, 2, 1, 1], [1], [0]>} : vector<8x4x8xbf16>, vector<4x8x8xbf16>, vector<4x8x8xf32> -> vector<4x8x8xf32>
    %52 = tpu.transpose %51, [2, 0, 1] : vector<4x8x8xf32> -> vector<8x4x8xf32>
    "tpu.trace_stop"() : () -> ()
    %53 = tpu.reciprocal %49 {approx = true} : vector<4x8x1xf32> -> vector<4x8x1xf32>
    %54 = tpu.transpose %53, [1, 0, 2] : vector<4x8x1xf32> -> vector<8x4x1xf32>
    %55 = vector.broadcast %54 : vector<8x4x1xf32> to vector<8x4x8xf32>
    %56 = arith.mulf %52, %55 : vector<8x4x8xf32>
    %57 = vector.shape_cast %56 : vector<8x4x8xf32> to vector<8x32xf32>
    %58 = arith.truncf %57 : vector<8x32xf32> to vector<8x32xbf16>
    %c0_25 = arith.constant 0 : index
    %c0_26 = arith.constant 0 : index
    %59 = vector.load %arg9[%c0_25, %c0_26] : memref<32x32xbf16, #tpu.memory_space<vmem>>, vector<32x32xbf16>
    %cst_27 = arith.constant dense<0.000000e+00> : vector<8x32xf32>
    %60 = tpu.matmul %58, %59, %cst_27 {dimension_numbers = #tpu.dot_dimension_numbers<[1], [0], [0], [1], [0, 0, 1, 1], [], []>} : vector<8x32xbf16>, vector<32x32xbf16>, vector<8x32xf32> -> vector<8x32xf32>
    %c0_28 = arith.constant 0 : index
    %c0_29 = arith.constant 0 : index
    %61 = vector.load %arg10[%c0_28, %c0_29] : memref<1x32xf32, #tpu.memory_space<vmem>>, vector<1x32xf32>
    %62 = vector.broadcast %61 : vector<1x32xf32> to vector<8x32xf32>
    %63 = arith.addf %60, %62 : vector<8x32xf32>
    %64 = arith.addf %7, %63 : vector<8x32xf32>
    %c0_30 = arith.constant 0 : index
    %c0_31 = arith.constant 0 : index
    %65 = vector.load %arg11[%c0_30, %c0_31] : memref<1x32xf32, #tpu.memory_space<vmem>>, vector<1x32xf32>
    %c0_32 = arith.constant 0 : index
    %c0_33 = arith.constant 0 : index
    %66 = vector.load %arg12[%c0_32, %c0_33] : memref<1x32xf32, #tpu.memory_space<vmem>>, vector<1x32xf32>
    %cst_34 = arith.constant dense<0.000000e+00> : vector<8xf32>
    %67 = vector.multi_reduction <add>, %64, %cst_34 [1] : vector<8x32xf32> to vector<8xf32>
    %68 = vector.shape_cast %67 : vector<8xf32> to vector<8x1xf32>
    %cst_35 = arith.constant 3.200000e+01 : f32
    %69 = vector.broadcast %cst_35 : f32 to vector<8x1xf32>
    %70 = arith.divf %68, %69 : vector<8x1xf32>
    %71 = arith.mulf %64, %64 : vector<8x32xf32>
    %cst_36 = arith.constant dense<0.000000e+00> : vector<8xf32>
    %72 = vector.multi_reduction <add>, %71, %cst_36 [1] : vector<8x32xf32> to vector<8xf32>
    %73 = vector.shape_cast %72 : vector<8xf32> to vector<8x1xf32>
    %cst_37 = arith.constant 3.200000e+01 : f32
    %74 = vector.broadcast %cst_37 : f32 to vector<8x1xf32>
    %75 = arith.divf %73, %74 : vector<8x1xf32>
    %76 = arith.mulf %70, %70 : vector<8x1xf32>
    %77 = arith.subf %75, %76 : vector<8x1xf32>
    %78 = vector.broadcast %70 : vector<8x1xf32> to vector<8x32xf32>
    %79 = arith.subf %64, %78 : vector<8x32xf32>
    %cst_38 = arith.constant 9.99999997E-7 : f32
    %80 = vector.broadcast %cst_38 : f32 to vector<8x1xf32>
    %81 = arith.addf %77, %80 : vector<8x1xf32>
    %82 = math.rsqrt %81 : vector<8x1xf32>
    %83 = vector.broadcast %82 : vector<8x1xf32> to vector<8x32xf32>
    %84 = arith.mulf %79, %83 : vector<8x32xf32>
    %85 = vector.broadcast %65 : vector<1x32xf32> to vector<8x32xf32>
    %86 = arith.mulf %84, %85 : vector<8x32xf32>
    %87 = vector.broadcast %66 : vector<1x32xf32> to vector<8x32xf32>
    %88 = arith.addf %86, %87 : vector<8x32xf32>
    %89 = arith.truncf %88 : vector<8x32xf32> to vector<8x32xbf16>
    %c0_39 = arith.constant 0 : index
    %c0_40 = arith.constant 0 : index
    %90 = vector.load %arg13[%c0_39, %c0_40] : memref<32x64xbf16, #tpu.memory_space<vmem>>, vector<32x64xbf16>
    %cst_41 = arith.constant dense<0.000000e+00> : vector<8x64xf32>
    %91 = tpu.matmul %89, %90, %cst_41 {dimension_numbers = #tpu.dot_dimension_numbers<[1], [0], [0], [1], [0, 0, 1, 1], [], []>} : vector<8x32xbf16>, vector<32x64xbf16>, vector<8x64xf32> -> vector<8x64xf32>
    %c0_42 = arith.constant 0 : index
    %c0_43 = arith.constant 0 : index
    %92 = vector.load %arg14[%c0_42, %c0_43] : memref<1x64xf32, #tpu.memory_space<vmem>>, vector<1x64xf32>
    %93 = vector.broadcast %92 : vector<1x64xf32> to vector<8x64xf32>
    %94 = arith.addf %91, %93 : vector<8x64xf32>
    %cst_44 = arith.constant 5.000000e-01 : f32
    %95 = vector.broadcast %cst_44 : f32 to vector<8x64xf32>
    %96 = arith.mulf %95, %94 : vector<8x64xf32>
    %cst_45 = arith.constant 4.471500e-02 : f32
    %97 = vector.broadcast %cst_45 : f32 to vector<8x64xf32>
    %98 = arith.mulf %97, %94 : vector<8x64xf32>
    %99 = arith.mulf %98, %94 : vector<8x64xf32>
    %100 = arith.mulf %99, %94 : vector<8x64xf32>
    %101 = arith.addf %94, %100 : vector<8x64xf32>
    %cst_46 = arith.constant 0.797884583 : f32
    %102 = vector.broadcast %cst_46 : f32 to vector<8x64xf32>
    %103 = arith.mulf %102, %101 : vector<8x64xf32>
    %104 = math.tanh %103 : vector<8x64xf32>
    %cst_47 = arith.constant 1.000000e+00 : f32
    %105 = vector.broadcast %cst_47 : f32 to vector<8x64xf32>
    %106 = arith.addf %105, %104 : vector<8x64xf32>
    %107 = arith.mulf %96, %106 : vector<8x64xf32>
    %108 = arith.truncf %107 : vector<8x64xf32> to vector<8x64xbf16>
    %c0_48 = arith.constant 0 : index
    %c0_49 = arith.constant 0 : index
    %109 = vector.load %arg15[%c0_48, %c0_49] : memref<64x32xbf16, #tpu.memory_space<vmem>>, vector<64x32xbf16>
    %cst_50 = arith.constant dense<0.000000e+00> : vector<8x32xf32>
    %110 = tpu.matmul %108, %109, %cst_50 {dimension_numbers = #tpu.dot_dimension_numbers<[1], [0], [0], [1], [0, 0, 1, 1], [], []>} : vector<8x64xbf16>, vector<64x32xbf16>, vector<8x32xf32> -> vector<8x32xf32>
    %c0_51 = arith.constant 0 : index
    %c0_52 = arith.constant 0 : index
    %111 = vector.load %arg16[%c0_51, %c0_52] : memref<1x32xf32, #tpu.memory_space<vmem>>, vector<1x32xf32>
    %112 = vector.broadcast %111 : vector<1x32xf32> to vector<8x32xf32>
    %113 = arith.addf %110, %112 : vector<8x32xf32>
    %114 = arith.addf %64, %113 : vector<8x32xf32>
    %c0_53 = arith.constant 0 : index
    %c0_54 = arith.constant 0 : index
    %c0_55 = arith.constant 0 : index
    %115 = vector.load %arg17[%c0_53, %c0_54, %c0_55] : memref<1x8x32xf32, #tpu.memory_space<vmem>>, vector<1x8x32xf32>
    %116 = vector.shape_cast %115 : vector<1x8x32xf32> to vector<8x32xf32>
    %117 = vector.shape_cast %114 : vector<8x32xf32> to vector<1x8x32xf32>
    tpu.vector_store %arg17[%c0_53, %c0_54, %c0_55], %117 {strides = array<i32>} : memref<1x8x32xf32, #tpu.memory_space<vmem>>, vector<1x8x32xf32>,
    return
  }
  func.func @transform_0(%arg0: i32, %arg1: i32) -> (i32, i32, i32) {
    %c0_i32 = arith.constant 0 : i32
    %c0_i32_0 = arith.constant 0 : i32
    %c0_i32_1 = arith.constant 0 : i32
    return %arg0, %c0_i32, %c0_i32_0 : i32, i32, i32
  }
  func.func @transform_1(%arg0: i32, %arg1: i32) -> (i32, i32) {
    %c0_i32 = arith.constant 0 : i32
    %c0_i32_0 = arith.constant 0 : i32
    %c0_i32_1 = arith.constant 0 : i32
    return %c0_i32, %c0_i32_0 : i32, i32
  }
  func.func @transform_2(%arg0: i32, %arg1: i32) -> (i32, i32) {
    %c0_i32 = arith.constant 0 : i32
    %c0_i32_0 = arith.constant 0 : i32
    %c0_i32_1 = arith.constant 0 : i32
    return %c0_i32, %c0_i32_0 : i32, i32
  }
  func.func @transform_3(%arg0: i32, %arg1: i32) -> (i32, i32) {
    %c0_i32 = arith.constant 0 : i32
    %c0_i32_0 = arith.constant 0 : i32
    %c0_i32_1 = arith.constant 0 : i32
    return %c0_i32, %c0_i32_0 : i32, i32
  }
  func.func @transform_4(%arg0: i32, %arg1: i32) -> (i32, i32) {
    %c0_i32 = arith.constant 0 : i32
    %c0_i32_0 = arith.constant 0 : i32
    %c0_i32_1 = arith.constant 0 : i32
    return %c0_i32, %c0_i32_0 : i32, i32
  }
  func.func @transform_5(%arg0: i32, %arg1: i32) -> (i32, i32) {
    %c0_i32 = arith.constant 0 : i32
    %c0_i32_0 = arith.constant 0 : i32
    %c0_i32_1 = arith.constant 0 : i32
    return %c0_i32, %c0_i32_0 : i32, i32
  }
  func.func @transform_6(%arg0: i32, %arg1: i32) -> (i32, i32) {
    %c0_i32 = arith.constant 0 : i32
    %c0_i32_0 = arith.constant 0 : i32
    %c0_i32_1 = arith.constant 0 : i32
    return %c0_i32, %c0_i32_0 : i32, i32
  }
  func.func @transform_7(%arg0: i32, %arg1: i32) -> (i32, i32) {
    %c0_i32 = arith.constant 0 : i32
    %c0_i32_0 = arith.constant 0 : i32
    %c0_i32_1 = arith.constant 0 : i32
    return %c0_i32, %c0_i32_0 : i32, i32
  }
  func.func @transform_8(%arg0: i32, %arg1: i32) -> (i32, i32) {
    %c0_i32 = arith.constant 0 : i32
    %c0_i32_0 = arith.constant 0 : i32
    %c0_i32_1 = arith.constant 0 : i32
    return %c0_i32, %c0_i32_0 : i32, i32
  }
  func.func @transform_9(%arg0: i32, %arg1: i32) -> (i32, i32) {
    %c0_i32 = arith.constant 0 : i32
    %c0_i32_0 = arith.constant 0 : i32
    %c0_i32_1 = arith.constant 0 : i32
    return %c0_i32, %c0_i32_0 : i32, i32
  }
  func.func @transform_10(%arg0: i32, %arg1: i32) -> (i32, i32) {
    %c0_i32 = arith.constant 0 : i32
    %c0_i32_0 = arith.constant 0 : i32
    %c0_i32_1 = arith.constant 0 : i32
    return %c0_i32, %c0_i32_0 : i32, i32
  }
  func.func @transform_11(%arg0: i32, %arg1: i32) -> (i32, i32) {
    %c0_i32 = arith.constant 0 : i32
    %c0_i32_0 = arith.constant 0 : i32
    %c0_i32_1 = arith.constant 0 : i32
    return %c0_i32, %c0_i32_0 : i32, i32
  }
  func.func @transform_12(%arg0: i32, %arg1: i32) -> (i32, i32) {
    %c0_i32 = arith.constant 0 : i32
    %c0_i32_0 = arith.constant 0 : i32
    %c0_i32_1 = arith.constant 0 : i32
    return %c0_i32, %c0_i32_0 : i32, i32
  }
  func.func @transform_13(%arg0: i32, %arg1: i32) -> (i32, i32) {
    %c0_i32 = arith.constant 0 : i32
    %c0_i32_0 = arith.constant 0 : i32
    %c0_i32_1 = arith.constant 0 : i32
    return %c0_i32, %c0_i32_0 : i32, i32
  }
  func.func @transform_14(%arg0: i32, %arg1: i32) -> (i32, i32) {
    %c0_i32 = arith.constant 0 : i32
    %c0_i32_0 = arith.constant 0 : i32
    %c0_i32_1 = arith.constant 0 : i32
    return %c0_i32, %c0_i32_0 : i32, i32
  }
  func.func @transform_15(%arg0: i32, %arg1: i32) -> (i32, i32, i32) {
    %c0_i32 = arith.constant 0 : i32
    %c0_i32_0 = arith.constant 0 : i32
    return %arg0, %arg1, %c0_i32 : i32, i32, i32
  }
}

</mosaic_0001>

<bundles_post_ra>
// kernel: tpu_custom_call.1
= control target key start
LH: loop header
LB: loop body
LE: loop exit
PB: predicated region body
PF: predicated region fallthrough
CT: control target
= control target key end

     0   :  { %s5129_s0 = inlined_call_operand.hbm [shape: f32[2,8,32], index: 0, kind: input, shape index: {}]   ;;  %s5130_s1 = inlined_call_operand.hbm [shape: f32[1,32], index: 1, kind: input, shape index: {}]   ;;  %s5131_s2 = inlined_call_operand.hbm [shape: f32[1,32], index: 2, kind: input, shape index: {}]   ;;  %s5132_s3 = inlined_call_operand.hbm [shape: bf16[32,32], index: 3, kind: input, shape index: {}]   ;;  %s5133_s4 = inlined_call_operand.hbm [shape: f32[1,32], index: 4, kind: input, shape index: {}]   ;;  %s5134_s5 = inlined_call_operand.hbm [shape: bf16[32,64], index: 5, kind: input, shape index: {}]   ;;  %s5135_s6 = inlined_call_operand.hbm [shape: f32[1,64], index: 6, kind: input, shape index: {}]   ;;  %s5136_s7 = inlined_call_operand.hbm [shape: bf16[32,32], index: 7, kind: input, shape index: {}]   ;;  %s5137_s8 = inlined_call_operand.hbm [shape: f32[1,32], index: 8, kind: input, shape index: {}]   ;;  %s5138_s9 = inlined_call_operand.hbm [shape: f32[1,32], index: 9, kind: input, shape index: {}]   ;;  %s5139_s10 = inlined_call_operand.hbm [shape: f32[1,32], index: 10, kind: input, shape index: {}]   ;;  %s5140_s11 = inlined_call_operand.hbm [shape: bf16[32,64], index: 11, kind: input, shape index: {}]   ;;  %s5141_s12 = inlined_call_operand.hbm [shape: f32[1,64], index: 12, kind: input, shape index: {}]   ;;  %s5142_s13 = inlined_call_operand.hbm [shape: bf16[64,32], index: 13, kind: input, shape index: {}]   ;;  %s5143_s14 = inlined_call_operand.hbm [shape: f32[1,32], index: 14, kind: input, shape index: {}]   ;;  %s5144_s15 = inlined_call_operand.hbm [shape: f32[2,8,32], index: 15, kind: output, shape index: {}]  }
   0x1   :  { %5170 = sst [smem:[#allocation38_spill]] %s5129_s0 }
   0x2   :  { %5171 = sst [smem:[#allocation39_spill]] %s5130_s1 }
   0x3   :  { %5172 = sst [smem:[#allocation40_spill]] %s5131_s2 }
   0x4   :  { %5173 = sst [smem:[#allocation41_spill]] %s5132_s3 }
   0x5   :  { %5174 = sst [smem:[#allocation42_spill]] %s5133_s4 }
   0x6   :  { %5175 = sst [smem:[#allocation43_spill]] %s5134_s5 }
   0x7   :  { %5176 = sst [smem:[#allocation44_spill]] %s5135_s6 }
   0x8   :  { %5177 = sst [smem:[#allocation45_spill]] %s5136_s7 }
   0x9   :  { %5178 = sst [smem:[#allocation46_spill]] %s5137_s8 }
   0xa   :  { %5179 = sst [smem:[#allocation47_spill]] %s5138_s9 }
   0xb   :  { %5180 = sst [smem:[#allocation48_spill]] %s5139_s10 }
   0xc   :  { %5181 = sst [smem:[#allocation49_spill]] %s5140_s11 }
   0xd   :  { %5182 = sst [smem:[#allocation50_spill]] %s5141_s12 }
   0xe   :  { %5183 = sst [smem:[#allocation51_spill]] %s5142_s13 }
   0xf   :  { %5184 = sst [smem:[#allocation52_spill]] %s5143_s14 }
  0x10   :  { %5185 = sst [smem:[#allocation53_spill]] %s5144_s15 }
  0x11   :  { %20 = vsyncpa [#allocation5], 0 }
  0x12   :  { %21 = vsyncpa [#allocation8], 0 }
  0x13   :  { %22 = vsyncpa [#allocation11], 0 }
  0x14   :  { %23 = vsyncpa [#allocation14], 0 }
  0x15   :  { %24 = vsyncpa [#allocation17], 0 }
  0x16   :  { %25 = vsyncpa [#allocation20], 0 }
  0x17   :  { %26 = vsyncpa [#allocation23], 0 }
  0x18   :  { %27 = vsyncpa [#allocation26], 0 }
  0x19   :  { %28 = vsyncpa [#allocation6], 0 }
  0x1a   :  { %30 = vsyncpa [#allocation6 + $0x1], 0  ;;  %s4383_s18 = smov 0   ;;  %s4385_s19 = smov 0  }
  0x1b   :  { %s4387_s20 = smov 0   ;;  %s4389_s21 = smov 0  }
  0x1c   :  { %s4391_s22 = smov 0   ;;  %s4393_s23 = smov 0  }
  0x1d LB: > { %s4273_s24 = smov [#allocation7]   ;;  %s5145_s26 = sadd.s32 4294967295, %s4271_s23   ;;  %s4271_s23 = sphi %s4393_s23, %s36_s23   ;;  %s4267_s22 = sphi %s4391_s22, %s5226_s22   ;;  %s4263_s21 = sphi %s4389_s21, %s5225_s21   ;;  %s4259_s20 = sphi %s4387_s20, %s5224_s20   ;;  %s4255_s19 = sphi %s4385_s19, %s5223_s19   ;;  %s4251_s18 = sphi %s4383_s18, %s5222_s18  }
  0x1e   : > { %s427_s25 = sshll.u32 %s4273_s24, 4  ;;  %p3287_p0 = scmp.ge.s32.totalorder %s4271_s23, 1  ;;  %s4422_s25 = int_to_ptr.vmem [resolvable:$true] %s427_s25 }
  0x1f   : > { %p4417_p1 = scmp.eq.s32.totalorder %s5145_s26, 0  ;;  %p401_p2 = scmp.lt.s32.totalorder %s4271_s23, 3 }
  0x20   : > { %s4274_s29 = smov [#allocation10]   ;;  %s4275_s17 = smov [#allocation13]  }
  0x21   : > { %s5186_s27 = scalar_select %p4417_p1, 1, 0 }
  0x22   : > { %p4424_p3 = pnand %p3287_p0, %p401_p2  ;;  %s448_s30 = sshll.u32 %s4274_s29, 4  ;;  %s4430_s30 = int_to_ptr.vmem [resolvable:$true] %s448_s30 }
  0x23   : > { %s472_s24 = sshll.u32 %s4275_s17, 4  ;;  %s4276_s26 = smov [#allocation16]   ;;  %s4441_s24 = int_to_ptr.vmem [resolvable:$true] %s472_s24 }
  0x24   : > { %s5187_s28 = scalar_select %p4424_p3, 1, 0 }
  0x25   : > { %p5152_p4 = pneg %p4424_p3  ;;  %s4443_s15 = sshll.u32 %s4276_s26, 4  ;;  %s497_s15 = int_to_ptr.vmem [resolvable:$true] %s4443_s15 }
  0x26   : > { %s5189_s1 = sld [smem:[#allocation39_spill]] }
  0x27   : > { %p4437_p5 = pnand %p5152_p4, %p4417_p1 }
  0x29   : > { %s5188_s16 = scalar_select %p4437_p5, 1, 0 }
  0x2a   : > { %p4453_p7 = pneg %p4437_p5 }
  0x2c   : > { %s3739_s12 = scalar_lea.hbm %s5189_s1, 16 }
  0x2d   : > { %p3740_p6 = scmp.ne.s32.totalorder %s5189_s1, %s3739_s12  ;;  %p3746_p10 = scmp.lt.u32.totalorder %s3739_s12, %s5189_s1 }
  0x2e   : > { %s5190_s6 = scalar_select %p4453_p7, 1, 0 }
  0x2f   : > { %p3742_p8 = pnand %p4453_p7, %p3740_p6 }
  0x31   : > { %p3743_p9 = pneg %p3742_p8 }
  0x33   : > { %p3748_p11 = pnand %p3746_p10, %p3743_p9 }
  0x35   : > { %3751 = shalt.err (!%p3748_p11)
}
  0x36   : > { %s3752_s8 = scalar_lea.vmem %s4422_s25, 16  ;;  %s3759_s10 = scalar_lea.vmem %s4422_s25, 32 }
  0x37   : > { %p3753_p12 = scmp.ne.s32.totalorder %s4422_s25, %s3752_s8  ;;  %p3760_p2 = scmp.lt.s32.totalorder %s4422_s25, %s4422_s25 }
  0x38   : > { %p3761_p6 = scmp.lt.s32.totalorder %s3759_s10, %s3752_s8 }
  0x39   : > { %p3755_p13 = pnand %p3753_p12, %p4453_p7 }
  0x3a   : > { %p3762_p8 = por %p3761_p6, %p3760_p2 }
  0x3b   : > { %p3756_p0 = pneg %p3755_p13 }
  0x3d   : > { %p3763_p4 = pnand %p3762_p8, %p3756_p0 }
  0x3f   : > { %3766 = shalt.err (!%p3763_p4)
}
  0x40   : > { %3550 = dma.hbm_to_vmem [thread:$0]  (!%p4437_p5), %s5189_s1, 16, %s4422_s25, [#allocation8]  }
  0x41   : > { %s5191_s3 = sld [smem:[#allocation41_spill]] }
  0x47   : > { %s3767_s26 = scalar_lea.hbm %s5191_s3, 256 }
  0x48   : > { %p3768_p9 = scmp.ne.s32.totalorder %s5191_s3, %s3767_s26  ;;  %p3774_p4 = scmp.lt.u32.totalorder %s3767_s26, %s5191_s3 }
  0x4a   : > { %p3770_p10 = pnand %p3768_p9, %p4453_p7 }
  0x4c   : > { %p3771_p11 = pneg %p3770_p10 }
  0x4e   : > { %p3776_p12 = pnand %p3774_p4, %p3771_p11 }
  0x50   : > { %3779 = shalt.err (!%p3776_p12)
}
  0x51   : > { %s3780_s25 = scalar_lea.vmem %s4430_s30, 256  ;;  %p3788_p6 = scmp.lt.s32.totalorder %s4430_s30, %s4430_s30 }
  0x52   : > { %p3781_p13 = scmp.ne.s32.totalorder %s4430_s30, %s3780_s25  ;;  %p3789_p8 = scmp.lt.s32.totalorder %s3780_s25, %s3780_s25 }
  0x54   : > { %p3783_p0 = pnand %p3781_p13, %p4453_p7  ;;  %p3790_p9 = por %p3789_p8, %p3788_p6 }
  0x56   : > { %p3784_p2 = pneg %p3783_p0 }
  0x58   : > { %p3791_p10 = pnand %p3790_p9, %p3784_p2 }
  0x5a   : > { %3794 = shalt.err (!%p3791_p10)
}
  0x5b   : > { %s4277_s2 = smov 64   ;;  %s4278_s4 = smov 4  }
  0x5c   : > { %3556 = dma.hbm_to_vmem [thread:$0]  (!%p4437_p5), %s5191_s3, 256, %s4430_s30, [#allocation11], %s4277_s2, %s4277_s2, %s4278_s4  }
  0x5d   : > { %s5192_s5 = sld [smem:[#allocation43_spill]] }
  0x63   : > { %s3795_s26 = scalar_lea.hbm %s5192_s5, 256 }
  0x64   : > { %p3796_p11 = scmp.ne.s32.totalorder %s5192_s5, %s3795_s26  ;;  %p3802_p13 = scmp.lt.u32.totalorder %s3795_s26, %s5192_s5 }
  0x66   : > { %p3798_p4 = pnand %p3796_p11, %p4453_p7 }
  0x68   : > { %p3799_p12 = pneg %p3798_p4 }
  0x6a   : > { %p3804_p0 = pnand %p3802_p13, %p3799_p12 }
  0x6c   : > { %3807 = shalt.err (!%p3804_p0)
}
  0x6d   : > { %s3808_s30 = scalar_lea.vmem %s4441_s24, 256  ;;  %p3816_p9 = scmp.lt.s32.totalorder %s4441_s24, %s4441_s24 }
  0x6e   : > { %p3809_p2 = scmp.ne.s32.totalorder %s4441_s24, %s3808_s30  ;;  %p3817_p10 = scmp.lt.s32.totalorder %s3808_s30, %s3808_s30 }
  0x70   : > { %p3811_p6 = pnand %p3809_p2, %p4453_p7  ;;  %p3818_p11 = por %p3817_p10, %p3816_p9 }
  0x72   : > { %p3812_p8 = pneg %p3811_p6 }
  0x74   : > { %p3819_p4 = pnand %p3818_p11, %p3812_p8 }
  0x76   : > { %3822 = shalt.err (!%p3819_p4)
}
  0x77   : > { %3562 = dma.hbm_to_vmem [thread:$0]  (!%p4437_p5), %s5192_s5, 256, %s4441_s24, [#allocation14], %s4277_s2, %s4277_s2, %s4278_s4  }
  0x78   : > { %s5193_s7 = sld [smem:[#allocation45_spill]] }
  0x7e   : > { %s3823_s17 = scalar_lea.hbm %s5193_s7, 256 }
  0x7f   : > { %p3824_p12 = scmp.ne.s32.totalorder %s5193_s7, %s3823_s17  ;;  %p3830_p2 = scmp.lt.u32.totalorder %s3823_s17, %s5193_s7 }
  0x81   : > { %p3826_p13 = pnand %p3824_p12, %p4453_p7 }
  0x83   : > { %p3827_p0 = pneg %p3826_p13 }
  0x85   : > { %p3832_p6 = pnand %p3830_p2, %p3827_p0 }
  0x87   : > { %3835 = shalt.err (!%p3832_p6)
}
  0x88   : > { %s3836_s30 = scalar_lea.vmem %s497_s15, 256  ;;  %p3844_p11 = scmp.lt.s32.totalorder %s497_s15, %s497_s15 }
  0x89   : > { %p3837_p8 = scmp.ne.s32.totalorder %s497_s15, %s3836_s30  ;;  %p3845_p4 = scmp.lt.s32.totalorder %s3836_s30, %s3836_s30 }
  0x8b   : > { %p3839_p9 = pnand %p3837_p8, %p4453_p7  ;;  %p3846_p3 = por %p3845_p4, %p3844_p11 }
  0x8d   : > { %p3840_p10 = pneg %p3839_p9 }
  0x8f   : > { %p3847_p1 = pnand %p3846_p3, %p3840_p10 }
  0x91   : > { %3850 = shalt.err (!%p3847_p1)
}
  0x92   : > { %3568 = dma.hbm_to_vmem [thread:$0]  (!%p4437_p5), %s5193_s7, 256, %s497_s15, [#allocation17], %s4277_s2, %s4277_s2, %s4278_s4  }
  0x93   : > { %s4279_s12 = smov [#allocation19]   ;;  %s4280_s29 = smov [#allocation22]  }
  0x94   : > { %s521_s14 = sshll.u32 %s4279_s12, 4  ;;  %s542_s17 = sshll.u32 %s4280_s29, 4  ;;  %s522_s14 = int_to_ptr.vmem [resolvable:$true] %s521_s14  ;;  %s543_s17 = int_to_ptr.vmem [resolvable:$true] %s542_s17 }
  0x95   : > { %s5194_s9 = sld [smem:[#allocation47_spill]] }
  0x9b   : > { %s3851_s10 = scalar_lea.hbm %s5194_s9, 16 }
  0x9c   : > { %p3852_p1 = scmp.ne.s32.totalorder %s5194_s9, %s3851_s10  ;;  %p3858_p13 = scmp.lt.u32.totalorder %s3851_s10, %s5194_s9 }
  0x9e   : > { %p3854_p3 = pnand %p3852_p1, %p4453_p7 }
  0xa0   : > { %p3855_p12 = pneg %p3854_p3 }
  0xa2   : > { %p3860_p0 = pnand %p3858_p13, %p3855_p12 }
  0xa4   : > { %3863 = shalt.err (!%p3860_p0)
}
  0xa5   : > { %s3864_s15 = scalar_lea.vmem %s522_s14, 16  ;;  %s3871_s1 = scalar_lea.vmem %s522_s14, 32 }
  0xa6   : > { %p3865_p2 = scmp.ne.s32.totalorder %s522_s14, %s3864_s15  ;;  %p3872_p9 = scmp.lt.s32.totalorder %s522_s14, %s522_s14 }
  0xa7   : > { %p3873_p10 = scmp.lt.s32.totalorder %s3871_s1, %s3864_s15 }
  0xa8   : > { %p3867_p6 = pnand %p3865_p2, %p4453_p7 }
  0xa9   : > { %p3874_p11 = por %p3873_p10, %p3872_p9 }
  0xaa   : > { %p3868_p8 = pneg %p3867_p6 }
  0xac   : > { %p3875_p4 = pnand %p3874_p11, %p3868_p8 }
  0xae   : > { %3878 = shalt.err (!%p3875_p4)
}
  0xaf   : > { %3574 = dma.hbm_to_vmem [thread:$0]  (!%p4437_p5), %s5194_s9, 16, %s522_s14, [#allocation20]  }
  0xb0   : > { %s5195_s11 = sld [smem:[#allocation49_spill]] }
  0xb6   : > { %s3879_s8 = scalar_lea.hbm %s5195_s11, 256 }
  0xb7   : > { %p3880_p1 = scmp.ne.s32.totalorder %s5195_s11, %s3879_s8  ;;  %p3886_p13 = scmp.lt.u32.totalorder %s3879_s8, %s5195_s11 }
  0xb9   : > { %p3882_p3 = pnand %p3880_p1, %p4453_p7 }
  0xbb   : > { %p3883_p12 = pneg %p3882_p3 }
  0xbd   : > { %p3888_p0 = pnand %p3886_p13, %p3883_p12 }
  0xbf   : > { %3891 = shalt.err (!%p3888_p0)
}
  0xc0   : > { %s3892_s15 = scalar_lea.vmem %s543_s17, 256  ;;  %p3900_p9 = scmp.lt.s32.totalorder %s543_s17, %s543_s17 }
  0xc1   : > { %p3893_p2 = scmp.ne.s32.totalorder %s543_s17, %s3892_s15  ;;  %p3901_p10 = scmp.lt.s32.totalorder %s3892_s15, %s3892_s15 }
  0xc3   : > { %p3895_p6 = pnand %p3893_p2, %p4453_p7  ;;  %p3902_p11 = por %p3901_p10, %p3900_p9 }
  0xc5   : > { %p3896_p8 = pneg %p3895_p6 }
  0xc7   : > { %p3903_p4 = pnand %p3902_p11, %p3896_p8 }
  0xc9   : > { %3906 = shalt.err (!%p3903_p4)
}
  0xca   : > { %3580 = dma.hbm_to_vmem [thread:$0]  (!%p4437_p5), %s5195_s11, 256, %s543_s17, [#allocation23], %s4277_s2, %s4277_s2, %s4278_s4  }
  0xcb   : > { %s4281_s12 = smov [#allocation25]   ;;  %s5196_s13 = sld [smem:[#allocation51_spill]] }
  0xcc   : > { %s566_s29 = sshll.u32 %s4281_s12, 4  ;;  %s567_s29 = int_to_ptr.vmem [resolvable:$true] %s566_s29 }
  0xd1   : > { %s3907_s8 = scalar_lea.hbm %s5196_s13, 512 }
  0xd2   : > { %p3908_p1 = scmp.ne.s32.totalorder %s5196_s13, %s3907_s8  ;;  %p3914_p13 = scmp.lt.u32.totalorder %s3907_s8, %s5196_s13 }
  0xd4   : > { %p3910_p3 = pnand %p3908_p1, %p4453_p7 }
  0xd6   : > { %p3911_p12 = pneg %p3910_p3 }
  0xd8   : > { %p3916_p0 = pnand %p3914_p13, %p3911_p12 }
  0xda   : > { %3919 = shalt.err (!%p3916_p0)
}
  0xdb   : > { %s3920_s17 = scalar_lea.vmem %s567_s29, 512  ;;  %p3928_p9 = scmp.lt.s32.totalorder %s567_s29, %s567_s29 }
  0xdc   : > { %p3921_p2 = scmp.ne.s32.totalorder %s567_s29, %s3920_s17  ;;  %p3929_p10 = scmp.lt.s32.totalorder %s3920_s17, %s3920_s17 }
  0xde   : > { %p3923_p6 = pnand %p3921_p2, %p4453_p7  ;;  %p3930_p11 = por %p3929_p10, %p3928_p9 }
  0xe0   : > { %p3924_p8 = pneg %p3923_p6 }
  0xe2   : > { %p3931_p4 = pnand %p3930_p11, %p3924_p8 }
  0xe4   : > { %3934 = shalt.err (!%p3931_p4)
}
  0xe5   : > { %3586 = dma.hbm_to_vmem [thread:$0]  (!%p4437_p5), %s5196_s13, 512, %s567_s29, [#allocation26], %s4277_s2, %s4277_s2, %s4278_s4  }
  0xe6   : > { %s3286_s1 = sadd.s32 4294967294, %s4271_s23   ;;  %s48_s12 = sadd.s32 1, %s4267_s22 }
  0xe7   : > { %p50_p1 = scmp.ge.s32.totalorder %s48_s12, 2  ;;  %s55_s3 = sadd.s32 1, %s4259_s20 }
  0xe8   : > { %p68_p3 = scmp.ne.s32.totalorder %s4255_s19, %s4251_s18  ;;  %p387_p12 = scmp.ne.s32.totalorder %s4259_s20, %s4255_s19 }
  0xe9   : > { %s5228_s12 = smov (%p50_p1, %s48_s12), 0  ;;  %p5197_p13 = scmp.ne.s32.totalorder %s5186_s27, 0 }
  0xea   : > { %s5199_s8 = sadd.s32 4294967295, %s4271_s23   ;;  %s52_s2 = ssub.s32 %s4267_s22, %s5228_s12 }
  0xeb   : > { %p4620_p0 = por %p5197_p13, %p68_p3  ;;  %p388_p2 = scmp.eq.s32.totalorder %s5199_s8, 1 }
  0xec   : > { %p394_p6 = scmp.eq.s32.totalorder %s3286_s1, 1  ;;  %p53_p8 = scmp.eq.s32.totalorder %s52_s2, 0 }
  0xed   : > { %s5198_s26 = scalar_select %p4620_p0, 1, 0 }
  0xee   : > { %p4628_p9 = por %p388_p2, %p387_p12  ;;  %p4632_p10 = por %p394_p6, %p68_p3 }
  0xef   : > { %s5159_s10 = sshll.u32 %s4263_s21, 7  ;;  %s5202_s0 = sld [smem:[#allocation38_spill]] }
  0xf0   : > { %s5200_s4 = scalar_select %p4628_p9, 1, 0 }
  0xf1   : > { %s5201_s29 = scalar_select %p4632_p10, 1, 0 }
  0xf2   : > { %s4638_s25 = scalar_select %p53_p8, %s4259_s20, %s55_s3  }
  0xf3   : > { %s4282_s15 = smov [#allocation4]   ;;  %p5203_p11 = scmp.ne.s32.totalorder %s5187_s28, 0 }
  0xf4   : > { %s416_s14 = sshll.u32 %s4282_s15, 4  ;;  %s4283_s3 = smov [#allocation9]   ;;  %s417_s14 = int_to_ptr.vmem [resolvable:$true] %s416_s14 }
  0xf5   : > { %s4645_s17 = scalar_lea.hbm %s5202_s0, %s5159_s10  ;;  %p5204_p4 = pneg %p5203_p11 }
  0xf6   : > { %s438_s8 = sshll.u32 %s4283_s3, 4  ;;  %s3935_s2 = scalar_lea.hbm %s4645_s17, 128  ;;  %s439_s8 = int_to_ptr.vmem [resolvable:$true] %s438_s8 }
  0xf7   : > { %p4652_p1 = pnand %p5204_p4, %p4620_p0  ;;  %p3936_p3 = scmp.ne.s32.totalorder %s4645_s17, %s3935_s2 }
  0xf8   : > { %s3940_s15 = scalar_lea.hbm %s5202_s0, 256  ;;  %p3941_p6 = scmp.lt.u32.totalorder %s4645_s17, %s5202_s0 }
  0xf9   : > { %p3937_p12 = pneg %p4652_p1  ;;  %p3942_p8 = scmp.lt.u32.totalorder %s3940_s15, %s3935_s2 }
  0xfa   : > { %p3944_p10 = scmp.lt.u32.totalorder %s3935_s2, %s4645_s17 }
  0xfb   : > { %p3938_p13 = pnand %p3937_p12, %p3936_p3  ;;  %p3943_p4 = por %p3942_p8, %p3941_p6 }
  0xfd   : > { %p3939_p2 = pneg %p3938_p13  ;;  %p3945_p9 = por %p3944_p10, %p3943_p4 }
  0xff   : > { %p3946_p0 = pnand %p3945_p9, %p3939_p2 }
 0x101   : > { %3949 = shalt.err (!%p3946_p0)
}
 0x102   : > { %s3950_s3 = scalar_lea.vmem %s417_s14, 128  ;;  %p3958_p5 = scmp.lt.s32.totalorder %s417_s14, %s417_s14 }
 0x103   : > { %p3951_p11 = scmp.ne.s32.totalorder %s417_s14, %s3950_s3  ;;  %p3959_p7 = scmp.lt.s32.totalorder %s3950_s3, %s3950_s3 }
 0x105   : > { %p3953_p3 = pnand %p3951_p11, %p3937_p12  ;;  %p3960_p6 = por %p3959_p7, %p3958_p5 }
 0x107   : > { %p3954_p13 = pneg %p3953_p3 }
 0x109   : > { %p3961_p8 = pnand %p3960_p6, %p3954_p13 }
 0x10b   : > { %3964 = shalt.err (!%p3961_p8)
}
 0x10c   : > { %3547 = dma.hbm_to_vmem [thread:$0]  (!%p4652_p1), %s4645_s17, 128, %s417_s14, [#allocation5]  }
 0x10d   : > { %s5206_s2 = sld [smem:[#allocation40_spill]]  ;;  %p5207_p9 = scmp.ne.s32.totalorder %s5190_s6, 0 }
 0x113   : > { %s3965_s30 = scalar_lea.hbm %s5206_s2, 16 }
 0x114   : > { %p3966_p0 = scmp.ne.s32.totalorder %s5206_s2, %s3965_s30  ;;  %p3972_p5 = scmp.lt.u32.totalorder %s3965_s30, %s5206_s2 }
 0x116   : > { %p3968_p10 = pnand %p3966_p0, %p5207_p9 }
 0x118   : > { %p3969_p11 = pneg %p3968_p10 }
 0x11a   : > { %p3974_p7 = pnand %p3972_p5, %p3969_p11 }
 0x11c   : > { %3977 = shalt.err (!%p3974_p7)
}
 0x11d   : > { %s3978_s1 = scalar_lea.vmem %s439_s8, 16  ;;  %s3985_s17 = scalar_lea.vmem %s439_s8, 32 }
 0x11e   : > { %p3979_p1 = scmp.ne.s32.totalorder %s439_s8, %s3978_s1  ;;  %p3986_p4 = scmp.lt.s32.totalorder %s439_s8, %s439_s8 }
 0x11f   : > { %p3987_p3 = scmp.lt.s32.totalorder %s3985_s17, %s3978_s1 }
 0x120   : > { %p3981_p12 = pnand %p3979_p1, %p5207_p9 }
 0x121   : > { %p3988_p13 = por %p3987_p3, %p3986_p4 }
 0x122   : > { %p3982_p2 = pneg %p3981_p12 }
 0x124   : > { %p3989_p6 = pnand %p3988_p13, %p3982_p2 }
 0x126   : > { %3992 = shalt.err (!%p3989_p6)
}
 0x127   : > { %p5208_p8 = scmp.ne.s32.totalorder %s5188_s16, 0  ;;  %s4284_s0 = smov [#allocation12]  }
 0x128   : > { %s462_s10 = sshll.u32 %s4284_s0, 4  ;;  %s4285_s30 = smov [#allocation15]   ;;  %s463_s10 = int_to_ptr.vmem [resolvable:$true] %s462_s10 }
 0x129   : > { %3553 = dma.hbm_to_vmem [thread:$0]  (!%p5208_p8), %s5206_s2, 16, %s439_s8, [#allocation8]  }
 0x12a   : > { %s486_s24 = sshll.u32 %s4285_s30, 4  ;;  %s5209_s7 = sld [smem:[#allocation42_spill]]  ;;  %s487_s24 = int_to_ptr.vmem [resolvable:$true] %s486_s24 }
 0x130   : > { %s3993_s9 = scalar_lea.hbm %s5209_s7, 16 }
 0x131   : > { %p3994_p0 = scmp.ne.s32.totalorder %s5209_s7, %s3993_s9  ;;  %p4000_p5 = scmp.lt.u32.totalorder %s3993_s9, %s5209_s7 }
 0x133   : > { %p3996_p10 = pnand %p3994_p0, %p5207_p9 }
 0x135   : > { %p3997_p11 = pneg %p3996_p10 }
 0x137   : > { %p4002_p7 = pnand %p4000_p5, %p3997_p11 }
 0x139   : > { %4005 = shalt.err (!%p4002_p7)
}
 0x13a   : > { %s4006_s8 = scalar_lea.vmem %s463_s10, 16  ;;  %s4013_s5 = scalar_lea.vmem %s463_s10, 32 }
 0x13b   : > { %p4007_p1 = scmp.ne.s32.totalorder %s463_s10, %s4006_s8  ;;  %p4014_p4 = scmp.lt.s32.totalorder %s463_s10, %s463_s10 }
 0x13c   : > { %p4015_p3 = scmp.lt.s32.totalorder %s4013_s5, %s4006_s8 }
 0x13d   : > { %p4009_p12 = pnand %p4007_p1, %p5207_p9 }
 0x13e   : > { %p4016_p13 = por %p4015_p3, %p4014_p4 }
 0x13f   : > { %p4010_p2 = pneg %p4009_p12 }
 0x141   : > { %p4017_p6 = pnand %p4016_p13, %p4010_p2 }
 0x143   : > { %4020 = shalt.err (!%p4017_p6)
}
 0x144   : > { %3559 = dma.hbm_to_vmem [thread:$0]  (!%p5208_p8), %s5209_s7, 16, %s463_s10, [#allocation11]  }
 0x145   : > { %s5210_s15 = sld [smem:[#allocation44_spill]] }
 0x14b   : > { %s4021_s3 = scalar_lea.hbm %s5210_s15, 16 }
 0x14c   : > { %p4022_p0 = scmp.ne.s32.totalorder %s5210_s15, %s4021_s3  ;;  %p4028_p5 = scmp.lt.u32.totalorder %s4021_s3, %s5210_s15 }
 0x14e   : > { %p4024_p10 = pnand %p4022_p0, %p5207_p9 }
 0x150   : > { %p4025_p11 = pneg %p4024_p10 }
 0x152   : > { %p4030_p7 = pnand %p4028_p5, %p4025_p11 }
 0x154   : > { %4033 = shalt.err (!%p4030_p7)
}
 0x155   : > { %s4034_s5 = scalar_lea.vmem %s487_s24, 16  ;;  %s4041_s10 = scalar_lea.vmem %s487_s24, 32 }
 0x156   : > { %p4035_p1 = scmp.ne.s32.totalorder %s487_s24, %s4034_s5  ;;  %p4042_p4 = scmp.lt.s32.totalorder %s487_s24, %s487_s24 }
 0x157   : > { %p4043_p3 = scmp.lt.s32.totalorder %s4041_s10, %s4034_s5 }
 0x158   : > { %p4037_p12 = pnand %p4035_p1, %p5207_p9 }
 0x159   : > { %p4044_p13 = por %p4043_p3, %p4042_p4 }
 0x15a   : > { %p4038_p2 = pneg %p4037_p12 }
 0x15c   : > { %p4045_p6 = pnand %p4044_p13, %p4038_p2 }
 0x15e   : > { %4048 = shalt.err (!%p4045_p6)
}
 0x15f   : > { %3565 = dma.hbm_to_vmem [thread:$0]  (!%p5208_p8), %s5210_s15, 16, %s487_s24, [#allocation14]  }
 0x160   : > { %s4286_s9 = smov [#allocation18]   ;;  %s4287_s3 = smov [#allocation21]  }
 0x161   : > { %s510_s11 = sshll.u32 %s4286_s9, 4  ;;  %s532_s1 = sshll.u32 %s4287_s3, 4  ;;  %s511_s11 = int_to_ptr.vmem [resolvable:$true] %s510_s11  ;;  %s533_s1 = int_to_ptr.vmem [resolvable:$true] %s532_s1 }
 0x162   : > { %s5211_s8 = sld [smem:[#allocation46_spill]] }
 0x168   : > { %s4049_s2 = scalar_lea.hbm %s5211_s8, 16 }
 0x169   : > { %p4050_p0 = scmp.ne.s32.totalorder %s5211_s8, %s4049_s2  ;;  %p4056_p5 = scmp.lt.u32.totalorder %s4049_s2, %s5211_s8 }
 0x16b   : > { %p4052_p10 = pnand %p4050_p0, %p5207_p9 }
 0x16d   : > { %p4053_p11 = pneg %p4052_p10 }
 0x16f   : > { %p4058_p7 = pnand %p4056_p5, %p4053_p11 }
 0x171   : > { %4061 = shalt.err (!%p4058_p7)
}
 0x172   : > { %s4062_s24 = scalar_lea.vmem %s511_s11, 16  ;;  %s4069_s30 = scalar_lea.vmem %s511_s11, 32 }
 0x173   : > { %p4063_p1 = scmp.ne.s32.totalorder %s511_s11, %s4062_s24  ;;  %p4070_p4 = scmp.lt.s32.totalorder %s511_s11, %s511_s11 }
 0x174   : > { %p4071_p3 = scmp.lt.s32.totalorder %s4069_s30, %s4062_s24 }
 0x175   : > { %p4065_p12 = pnand %p4063_p1, %p5207_p9 }
 0x176   : > { %p4072_p13 = por %p4071_p3, %p4070_p4 }
 0x177   : > { %p4066_p2 = pneg %p4065_p12 }
 0x179   : > { %p4073_p6 = pnand %p4072_p13, %p4066_p2 }
 0x17b   : > { %4076 = shalt.err (!%p4073_p6)
}
 0x17c   : > { %3571 = dma.hbm_to_vmem [thread:$0]  (!%p5208_p8), %s5211_s8, 16, %s511_s11, [#allocation17]  }
 0x17d   : > { %s5212_s17 = sld [smem:[#allocation48_spill]] }
 0x183   : > { %s4077_s14 = scalar_lea.hbm %s5212_s17, 16 }
 0x184   : > { %p4078_p0 = scmp.ne.s32.totalorder %s5212_s17, %s4077_s14  ;;  %p4084_p5 = scmp.lt.u32.totalorder %s4077_s14, %s5212_s17 }
 0x186   : > { %p4080_p10 = pnand %p4078_p0, %p5207_p9 }
 0x188   : > { %p4081_p11 = pneg %p4080_p10 }
 0x18a   : > { %p4086_p7 = pnand %p4084_p5, %p4081_p11 }
 0x18c   : > { %4089 = shalt.err (!%p4086_p7)
}
 0x18d   : > { %s4090_s30 = scalar_lea.vmem %s533_s1, 16  ;;  %s4097_s11 = scalar_lea.vmem %s533_s1, 32 }
 0x18e   : > { %p4091_p1 = scmp.ne.s32.totalorder %s533_s1, %s4090_s30  ;;  %p4098_p4 = scmp.lt.s32.totalorder %s533_s1, %s533_s1 }
 0x18f   : > { %p4099_p3 = scmp.lt.s32.totalorder %s4097_s11, %s4090_s30 }
 0x190   : > { %p4093_p12 = pnand %p4091_p1, %p5207_p9 }
 0x191   : > { %p4100_p13 = por %p4099_p3, %p4098_p4 }
 0x192   : > { %p4094_p2 = pneg %p4093_p12 }
 0x194   : > { %p4101_p6 = pnand %p4100_p13, %p4094_p2 }
 0x196   : > { %4104 = shalt.err (!%p4101_p6)
}
 0x197   : > { %3577 = dma.hbm_to_vmem [thread:$0]  (!%p5208_p8), %s5212_s17, 16, %s533_s1, [#allocation20]  }
 0x198   : > { %s4288_s7 = smov [#allocation24]   ;;  %s4289_s14 = smov [#allocation27]  }
 0x199   : > { %s556_s2 = sshll.u32 %s4288_s7, 4  ;;  %s580_s5 = sshll.u32 %s4289_s14, 4  ;;  %s557_s2 = int_to_ptr.vmem [resolvable:$true] %s556_s2  ;;  %s581_s5 = int_to_ptr.vmem [resolvable:$true] %s580_s5 }
 0x19a   : > { %s5213_s24 = sld [smem:[#allocation50_spill]] }
 0x1a0   : > { %s4105_s8 = scalar_lea.hbm %s5213_s24, 16 }
 0x1a1   : > { %p4106_p0 = scmp.ne.s32.totalorder %s5213_s24, %s4105_s8  ;;  %p4112_p5 = scmp.lt.u32.totalorder %s4105_s8, %s5213_s24 }
 0x1a3   : > { %p4108_p10 = pnand %p4106_p0, %p5207_p9 }
 0x1a5   : > { %p4109_p11 = pneg %p4108_p10 }
 0x1a7   : > { %p4114_p7 = pnand %p4112_p5, %p4109_p11 }
 0x1a9   : > { %4117 = shalt.err (!%p4114_p7)
}
 0x1aa   : > { %s4118_s1 = scalar_lea.vmem %s557_s2, 16  ;;  %s4125_s3 = scalar_lea.vmem %s557_s2, 32 }
 0x1ab   : > { %p4119_p1 = scmp.ne.s32.totalorder %s557_s2, %s4118_s1  ;;  %p4126_p4 = scmp.lt.s32.totalorder %s557_s2, %s557_s2 }
 0x1ac   : > { %p4127_p3 = scmp.lt.s32.totalorder %s4125_s3, %s4118_s1 }
 0x1ad   : > { %p4121_p12 = pnand %p4119_p1, %p5207_p9 }
 0x1ae   : > { %p4128_p13 = por %p4127_p3, %p4126_p4 }
 0x1af   : > { %p4122_p2 = pneg %p4121_p12 }
 0x1b1   : > { %p4129_p6 = pnand %p4128_p13, %p4122_p2 }
 0x1b3   : > { %4132 = shalt.err (!%p4129_p6)
}
 0x1b4   : > { %3583 = dma.hbm_to_vmem [thread:$0]  (!%p5208_p8), %s5213_s24, 16, %s557_s2, [#allocation23]  }
 0x1b5   : > { %s5214_s10 = sld [smem:[#allocation52_spill]] }
 0x1bb   : > { %s4133_s0 = scalar_lea.hbm %s5214_s10, 16 }
 0x1bc   : > { %p4134_p0 = scmp.ne.s32.totalorder %s5214_s10, %s4133_s0  ;;  %p4140_p5 = scmp.lt.u32.totalorder %s4133_s0, %s5214_s10 }
 0x1be   : > { %p4136_p10 = pnand %p4134_p0, %p5207_p9 }
 0x1c0   : > { %p4137_p11 = pneg %p4136_p10 }
 0x1c2   : > { %p4142_p7 = pnand %p4140_p5, %p4137_p11 }
 0x1c4   : > { %4145 = shalt.err (!%p4142_p7)
}
 0x1c5   : > { %s4146_s3 = scalar_lea.vmem %s581_s5, 16  ;;  %s4153_s2 = scalar_lea.vmem %s581_s5, 32 }
 0x1c6   : > { %p4147_p1 = scmp.ne.s32.totalorder %s581_s5, %s4146_s3  ;;  %p4154_p4 = scmp.lt.s32.totalorder %s581_s5, %s581_s5 }
 0x1c7   : > { %p4155_p3 = scmp.lt.s32.totalorder %s4153_s2, %s4146_s3 }
 0x1c8   : > { %p4149_p12 = pnand %p4147_p1, %p5207_p9 }
 0x1c9   : > { %p4156_p13 = por %p4155_p3, %p4154_p4 }
 0x1ca   : > { %p4150_p2 = pneg %p4149_p12 }
 0x1cc   : > { %p4157_p6 = pnand %p4156_p13, %p4150_p2 }
 0x1ce   : > { %4160 = shalt.err (!%p4157_p6)
}
 0x1cf   : > { %3589 = dma.hbm_to_vmem [thread:$0]  (!%p5208_p8), %s5214_s10, 16, %s581_s5, [#allocation26]  }
 0x1d0   : > { %p5215_p0 = scmp.ne.s32.totalorder %s5187_s28, 0 }
 0x1d1   : > { %p5216_p10 = scmp.ne.s32.totalorder (!%p5215_p0), %s5198_s26, 0 }
 0x1d2   : > { %593 = sbr.rel (%p5215_p0) target bundleno = 3022 (0xbce), region = 80 }
 0x1d9   : > { %4214 = dma.done.wait (%p5216_p10), [#allocation5], 128  }
 0x1da   : > { %4216 = vsyncadd (%p5216_p10), [#allocation5], 4294967168  ;;  %p5217_p9 = scmp.ne.s32.totalorder %s5186_s27, 0 }
 0x1dc   : > { %4218 = dma.done.wait (%p5217_p9), [#allocation8], 32  }
 0x1dd   : > { %4220 = vsyncadd (%p5217_p9), [#allocation8], 4294967264 }
 0x1de   : > { %4222 = dma.done.wait (%p5217_p9), [#allocation11], 272  }
 0x1df   : > { %4224 = vsyncadd (%p5217_p9), [#allocation11], 4294967024 }
 0x1e0   : > { %4226 = dma.done.wait (%p5217_p9), [#allocation14], 272  }
 0x1e1   : > { %4228 = vsyncadd (%p5217_p9), [#allocation14], 4294967024 }
 0x1e2   : > { %4230 = dma.done.wait (%p5217_p9), [#allocation17], 272  }
 0x1e3   : > { %4232 = vsyncadd (%p5217_p9), [#allocation17], 4294967024 }
 0x1e4   : > { %4234 = dma.done.wait (%p5217_p9), [#allocation20], 32  }
 0x1e5   : > { %4236 = vsyncadd (%p5217_p9), [#allocation20], 4294967264 }
 0x1e6   : > { %4238 = dma.done.wait (%p5217_p9), [#allocation23], 272  }
 0x1e7   : > { %4240 = vsyncadd (%p5217_p9), [#allocation23], 4294967024 }
 0x1e8   : > { %4242 = dma.done.wait (%p5217_p9), [#allocation26], 528  }
 0x1e9   : > { %4244 = vsyncadd (%p5217_p9), [#allocation26], 4294966768  ;;  %vm700_vm0 = vcmask 261120   ;;  %v697_v0 = vld [vmem:[#allocation4] sm:$0xff]  ;;  %v4290_v5 = vmov 0.0   ;;  %vm4291_vm1 = vmmov 0   ;;  %v809_v50 = vlaneseq }
 0x1ea   : > { %v701_v1 = vsel %vm700_vm0, %v697_v0, 0.0  ;;  %v706_v2 = vmul.f32 %v697_v0, %v697_v0  ;;  %v3702_v4 = vld [vmem:[#allocation13] sm:$0xff]   ;;  %3392 = vmatprep.subr.bf16.mxu1 %v4290_v5  ;;  %3396 = vmatprep.mubr.msk.bf16.mxu1 %vm4291_vm1, %v4290_v5  ;;  %v3703_v6 = vld [vmem:[#allocation13 + $0x8] sm:$0xff]   ;;  %v3705_v34 = vld [vmem:[#allocation10 + $0x8] sm:$0xff]   ;;  %s4292_s6 = smov 112   ;;  %s4293_s27 = smov 120  }
 0x1eb   : > { %702 = vadd.xlane.f32.xlu0 %v701_v1  ;;  %1037 = vadd.xlane.f32.xlu1 %v701_v1  ;;  %v3319_v16 = vld [vmem:[#allocation7] ss:$0 sm:$0xff]  ;;  %v3320_v18 = vld [vmem:[#allocation9] ss:$0 sm:$0xff]  ;;  %v3704_v32 = vld [vmem:[#allocation10] sm:$0xff]   ;;  %s4294_s28 = smov 104  }
 0x1ec   : > { %v707_v3 = vsel %vm700_vm0, %v706_v2, 0.0  ;;  %3393 = vmatpush3.bf16.msra.mxu1 %v3702_v4  ;;  %3408 = vmatprep.subr.bf16.mxu0 %v4290_v5  ;;  %v3321_v37 = vld [vmem:[#allocation15] ss:$0 sm:$0xff]  ;;  %v4295_v48 = vmov 1983009808   ;;  %v810_v52 = vshrl.u32 %v809_v50, 7 }
 0x1ed   : > { %3394 = vmatprep.subr.bf16.mxu1 %v4290_v5  ;;  %3410 = vmatprep.mubr.msk.bf16.mxu0 %vm4291_vm1, %v4290_v5  ;;  %v807_v49 = vunpack.c.l.s4 %v4295_v48  ;;  %v4296_v53 = vmov 1934713408   ;;  %vm905_vm2 = vcmask 58368   ;;  %s4298_s16 = smov 96   ;;  %vm1579_vm3 = vcmask 1043456   ;;  %s4299_s26 = smov 16  }
 0x1ee   : > { %v824_v54 = vunpack.c.l.s4 %v4296_v53  ;;  %vm1575_vm4 = vcmask 64512   ;;  %s4300_s5 = smov 8   ;;  %s4301_s13 = smov 24   ;;  %vm2800_vm5 = vcmask 130048   ;;  %vm2802_vm6 = vcmask 195584  }
 0x1ef   : > { %708 = vadd.xlane.f32.xlu0 %v707_v3  ;;  %1043 = vadd.xlane.f32.xlu1 %v707_v3  ;;  %v808_v51 = vunpack.c.0.s8 %v807_v49  ;;  %vm3019_vm7 = vcmask 523264   ;;  %s689_s8 = sand.u32 1, %s4255_s19   ;;  %s5218_s9 = sshll.u32 %s4263_s21, 7 }
 0x1f0   : > { %3395 = vmatpush3.bf16.msra.mxu1 %v3703_v6  ;;  %v825_v56 = vunpack.c.0.s8 %v824_v54  ;;  %s3318_s0 = sshll.u32 %s689_s8, 3  ;;  %s5219_s2 = sld [smem:[#allocation53_spill]] }
 0x1f1   : > { %3400 = vmatprep.subr.bf16.mxu1 %v4290_v5  ;;  %v4865_v55 = vsub.s32 %v808_v51, %v810_v52  ;;  %s691_s30 = scalar_lea.vmem [#allocation28], %s3318_s0  ;;  %s3066_s14 = scalar_lea.sflag [#allocation6], %s689_s8 }
 0x1f2   : > { %v4869_v58 = vsub.s32 %v825_v56, %v810_v52  ;;  %s3080_s11 = sshll.u32 %s691_s30, 4  ;;  %p5220_p11 = scmp.ne.s32.totalorder %s5200_s4, 0  ;;  %s5083_s11 = int_to_ptr.vmem [resolvable:$true] %s3080_s11 }
 0x1f6   : > { %s5081_s7 = scalar_lea.hbm %s5219_s2, %s5218_s9 }
 0x278   : > { %v703_v7 = vpop.xlane.xlu0 %702  ;;  %v1038_v22 = vpop.xlane.xlu1 %1037 }
 0x279   : > { %v705_v8 = vmul.f32 0.03125, %v703_v7  ;;  %v1040_v23 = vmul.f32 0.03125, %v1038_v22 }
 0x27b   : > { %v711_v10 = vmul.f32 %v705_v8, %v705_v8  ;;  %v713_v14 = vsub.f32 %v697_v0, %v705_v8  ;;  %v1046_v25 = vmul.f32 %v1040_v23, %v1040_v23  ;;  %v1048_v29 = vsub.f32 %v697_v0, %v1040_v23 }
 0x27c   : > { %v709_v9 = vpop.xlane.xlu0 %708  ;;  %v1044_v24 = vpop.xlane.xlu1 %1043  ;;  %v4297_v8 = vmov 0  }
 0x27d   : > { %v710_v11 = vmul.f32 0.03125, %v709_v9  ;;  %v1045_v26 = vmul.f32 0.03125, %v1044_v24 }
 0x27f   : > { %v712_v12 = vsub.f32 %v710_v11, %v711_v10  ;;  %v1047_v27 = vsub.f32 %v1045_v26, %v1046_v25 }
 0x281   : > { %v714_v13 = vadd.f32 1e-06, %v712_v12  ;;  %v1049_v28 = vadd.f32 1e-06, %v1047_v27 }
 0x283   : > { %3714 = vrsqrt.f32 %v714_v13 }
 0x284   : > { %3716 = vrsqrt.f32 %v1049_v28 }
 0x28d   : > { %v3715_v15 = vpop.eup %3714 }
 0x28e   : > { %v716_v17 = vmul.f32 %v3715_v15, %v713_v14  ;;  %v3717_v30 = vpop.eup %3716 }
 0x28f   : > { %v1051_v31 = vmul.f32 %v3717_v30, %v1048_v29 }
 0x290   : > { %v723_v19 = vmul.f32 %v3319_v16, %v716_v17 }
 0x291   : > { %v1058_v33 = vmul.f32 %v3319_v16, %v1051_v31 }
 0x292   : > { %v730_v20 = vadd.f32 %v3320_v18, %v723_v19 }
 0x293   : > { %v1065_v35 = vadd.f32 %v3320_v18, %v1058_v33  ;;  %v3327_v33 = vld [vmem:[#allocation12] ss:$0 sm:$0xff] }
 0x294   : > { %v731_v21 = vpack.c.bf16 %v730_v20, %v730_v20 }
 0x295   : > { %v1066_v36 = vpack.c.bf16 %v1065_v35, %v1065_v35 }
 0x296   : > { %3397 = vmatmul.mubr.msk.bf16.vlgmr.msra.gmra.mrb[0].mxu1 %vm700_vm0, %v731_v21 }
 0x297   : > { %3404 = vmatprep.mubr.msk.bf16.mxu1 %vm4291_vm1, %v4290_v5  ;;  %3401 = vmatpush3.bf16.msra.mxu1 %v3704_v32 }
 0x298   : > { %3402 = vmatprep.subr.bf16.mxu1 %v4290_v5 }
 0x29b   : > { %3403 = vmatpush3.bf16.msra.mxu1 %v3705_v34 }
 0x29c   : > { %3414 = vmatprep.subr.bf16.mxu1 %v4290_v5 }
 0x29e   : > { %3405 = vmatmul.mubr.msk.bf16.vlgmr.msra.gmra.mrb[4].mxu1 %vm700_vm0, %v1066_v36 }
 0x29f   : > { %3416 = vmatprep.mubr.msk.bf16.mxu1 %vm4291_vm1, %v4290_v5 }
 0x369   : > { %v792_v38 = vpop.f32.mrb[0].mxu1 }
 0x36a   : > { %v793_v39 = vadd.f32 %v3321_v37, %v792_v38  ;;  %v3398_v40 = vpop.f32.mrb[1].mxu1 }
 0x36b   : > { %v795_v41 = vpop.f32.mrb[2].mxu1 }
 0x36c   : > { %v4855_v42 = vpack.c.bf16 %v793_v39, %v793_v39  ;;  %v3399_v43 = vpop.f32.mrb[3].mxu1 }
 0x36e   : > { %802 = vrot.lane.b32.xlu1 %v4855_v42, %s4292_s6  ;;  %800 = vrot.lane.b32.xlu0 %v4855_v42, %s4293_s27  ;;  %v812_v59 = vrot.slane %v4855_v42, %v4865_v55 }
 0x371   : > { %v4863_v44 = vpop.f32.mrb[4].mxu1 }
 0x372   : > { %804 = vrot.lane.b32.xlu1 %v4855_v42, %s4294_s28  ;;  %v3406_v45 = vpop.f32.mrb[5].mxu1  ;;  %v1128_v35 = vadd.f32 %v3327_v33, %v4863_v44 }
 0x373   : > { %v1130_v46 = vpop.f32.mrb[6].mxu1 }
 0x374   : > { %v3407_v47 = vpop.f32.mrb[7].mxu1  ;;  %v4900_v38 = vpack.c.bf16 %v1128_v35, %v1128_v35 }
 0x3e0   : > { %v4867_v57 = vpop.permute.xlu1 %802  ;;  %v4875_v63 = vpop.permute.xlu0 %800 }
 0x3e1   : > { %v820_v60 = vrot.slane %v4867_v57, %v4865_v55  ;;  %v846_v3 = vrot.slane %v4875_v63, %v4865_v55 }
 0x3e3   : > { %v821_v61 = vcombine.low %v812_v59, %v820_v60  ;;  %v822_v62 = vcombine.high %v812_v59, %v820_v60 }
 0x3e4   : > { %v4877_v0 = vpop.permute.xlu1 %804 }
 0x3e5   : > { %v829_v1 = vrot.slane %v821_v61, %v4869_v58  ;;  %v854_v2 = vrot.slane %v4877_v0, %v4865_v55  ;;  %v836_v4 = vrot.slane %v822_v62, %v4869_v58 }
 0x3e7   : > { %v855_v6 = vcombine.low %v846_v3, %v854_v2  ;;  %v856_v7 = vcombine.high %v846_v3, %v854_v2  ;;  %v837_v9 = vcombine.high %v829_v1, %v4297_v8  ;;  %v838_v12 = vcombine.high %v836_v4, %v4297_v8 }
 0x3e8   : > { %v877_v13 = vshrl.u32 %v829_v1, 16  ;;  %v893_v19 = vshrl.u32 %v836_v4, 16 }
 0x3e9   : > { %v863_v10 = vrot.slane %v855_v6, %v4869_v58  ;;  %v870_v11 = vrot.slane %v856_v7, %v4869_v58  ;;  %v885_v18 = vshrl.u32 %v837_v9, 16  ;;  %v901_v26 = vshrl.u32 %v838_v12, 16 }
 0x3eb   : > { %v871_v14 = vcombine.high %v863_v10, %v4297_v8  ;;  %v872_v15 = vcombine.high %v870_v11, %v4297_v8  ;;  %v875_v16 = vpack.i.b16 %v863_v10, %v829_v1  ;;  %v878_v17 = vshrl.u32 %v863_v10, 16 }
 0x3ec   : > { %v891_v20 = vpack.i.b16 %v870_v11, %v836_v4  ;;  %v894_v21 = vshrl.u32 %v870_v11, 16 }
 0x3ed   : > { %v879_v22 = vpack.i.b16 %v878_v17, %v877_v13  ;;  %v883_v23 = vpack.i.b16 %v871_v14, %v837_v9  ;;  %v886_v24 = vshrl.u32 %v871_v14, 16  ;;  %v899_v25 = vpack.i.b16 %v872_v15, %v838_v12  ;;  %906 = vst.msk [vmem:[#allocation2] sm:$0x3] %vm905_vm2, %v875_v16 }
 0x3ee   : > { %v895_v27 = vpack.i.b16 %v894_v21, %v893_v19  ;;  %v902_v28 = vshrl.u32 %v872_v15, 16  ;;  %910 = vst.msk [vmem:[#allocation2 + $0x8] sm:$0x3] %vm905_vm2, %v891_v20 }
 0x3ef   : > { %v887_v29 = vpack.i.b16 %v886_v24, %v885_v18  ;;  %907 = vst.msk [vmem:[#allocation2 + $0x2] sm:$0x3] %vm905_vm2, %v879_v22  ;;  %908 = vst.msk [vmem:[#allocation2 + $0x4] sm:$0x3] %vm905_vm2, %v883_v23 }
 0x3f0   : > { %912 = vst.msk [vmem:[#allocation2 + $0xc] sm:$0x3] %vm905_vm2, %v899_v25  ;;  %v903_v30 = vpack.i.b16 %v902_v28, %v901_v26  ;;  %911 = vst.msk [vmem:[#allocation2 + $0xa] sm:$0x3] %vm905_vm2, %v895_v27 }
 0x3f1   : > { %909 = vst.msk [vmem:[#allocation2 + $0x6] sm:$0x3] %vm905_vm2, %v887_v29 }
 0x3f2   : > { %913 = vst.msk [vmem:[#allocation2 + $0xe] sm:$0x3] %vm905_vm2, %v903_v30 }
 0x3f4   : > { %v1141_v31 = vld [vmem:[#allocation2] sm:$0x3] }
 0x3f5   : > { %1157 = vxpose.xlu1.c.b16.start.end [1/1] (short) (narrow) %v1141_v31, 16  ;;  %v1145_v34 = vld [vmem:[#allocation2 + $0x8] sm:$0x3] }
 0x3f6   : > { %v1142_v32 = vld [vmem:[#allocation2 + $0x2] sm:$0x3]  ;;  %v1143_v36 = vld [vmem:[#allocation2 + $0x4] sm:$0x3] }
 0x3f7   : > { %1173 = vxpose.xlu0.c.b16.start.end [1/1] (short) (narrow) %v1142_v32, 16  ;;  %v1147_v37 = vld [vmem:[#allocation2 + $0xc] sm:$0x3]  ;;  %v1146_v39 = vld [vmem:[#allocation2 + $0xa] sm:$0x3] }
 0x3f8   : > { %v1144_v40 = vld [vmem:[#allocation2 + $0x6] sm:$0x3] }
 0x3f9   : > { %1221 = vxpose.xlu1.c.b16.start.end [1/1] (short) (narrow) %v1145_v34, 16  ;;  %v1148_v41 = vld [vmem:[#allocation2 + $0xe] sm:$0x3] }
 0x3fb   : > { %1189 = vxpose.xlu0.c.b16.start.end [1/1] (short) (narrow) %v1143_v36, 16 }
 0x3fd   : > { %1253 = vxpose.xlu1.c.b16.start.end [1/1] (short) (narrow) %v1147_v37, 16 }
 0x3ff   : > { %1237 = vxpose.xlu0.c.b16.start.end [1/1] (short) (narrow) %v1146_v39, 16 }
 0x401   : > { %1135 = vrot.lane.b32.xlu1 %v4900_v38, %s4293_s27  ;;  %s4302_s27 = smov [#allocation28]  }
 0x402   : > { %s4165_s21 = sshll.u32 %s4302_s27, 4  ;;  %s4166_s21 = int_to_ptr.vmem [resolvable:$false] %s4165_s21 }
 0x403   : > { %1205 = vxpose.xlu0.c.b16.start.end [1/1] (short) (narrow) %v1144_v40, 16  ;;  %p4168_p1 = scmp.lt.s32.totalorder %s5083_s11, %s4166_s21 }
 0x407   : > { %1269 = vxpose.xlu0.c.b16.start.end [1/1] (short) (narrow) %v1148_v41, 16 }
 0x45b   : > { %v1165_v43 = vpop.trf.xlu1 }
 0x45d   : > { %v1181_v45 = vpop.trf.xlu0 }
 0x45f   : > { %v1229_v46 = vpop.trf.xlu1 }
 0x460   : > { %v1285_v49 = vcombine.low %v1165_v43, %v1229_v46 }
 0x461   : > { %v1197_v47 = vpop.trf.xlu0 }
 0x462   : > { %v1292_v52 = vrot.slane %v1285_v49, %v4865_v55 }
 0x463   : > { %v1261_v44 = vpop.trf.xlu1 }
 0x464   : > { %v1293_v50 = vcombine.low %v1197_v47, %v1261_v44 }
 0x465   : > { %v1245_v48 = vpop.trf.xlu0 }
 0x466   : > { %v1300_v53 = vrot.slane %v1293_v50, %v4865_v55  ;;  %v1319_v54 = vcombine.low %v1181_v45, %v1245_v48 }
 0x468   : > { %v1301_v59 = vcombine.low %v1292_v52, %v1300_v53  ;;  %v1326_v61 = vrot.slane %v1319_v54, %v4865_v55  ;;  %v1302_v4 = vcombine.high %v1292_v52, %v1300_v53 }
 0x469   : > { %v1213_v51 = vpop.trf.xlu0 }
 0x46a   : > { %v1309_v3 = vrot.slane %v1301_v59, %v4869_v58  ;;  %v1316_v13 = vrot.slane %v1302_v4, %v4869_v58 }
 0x46c   : > { %v1357_v9 = vshrl.u32 %v1309_v3, 16  ;;  %v1317_v16 = vcombine.high %v1309_v3, %v4297_v8  ;;  %v1373_v19 = vshrl.u32 %v1316_v13, 16  ;;  %v1318_v22 = vcombine.high %v1316_v13, %v4297_v8 }
 0x46d   : > { %v1277_v56 = vpop.trf.xlu0 }
 0x46e   : > { %v1327_v60 = vcombine.low %v1213_v51, %v1277_v56  ;;  %v1365_v25 = vshrl.u32 %v1317_v16, 16  ;;  %v1381_v28 = vshrl.u32 %v1318_v22, 16 }
 0x470   : > { %v1334_v62 = vrot.slane %v1327_v60, %v4865_v55 }
 0x472   : > { %v1335_v1 = vcombine.low %v1326_v61, %v1334_v62  ;;  %v1336_v2 = vcombine.high %v1326_v61, %v1334_v62 }
 0x473   : > { %v1136_v32 = vpop.permute.xlu1 %1135 }
 0x474   : > { %v1343_v6 = vrot.slane %v1335_v1, %v4869_v58  ;;  %v1350_v11 = vrot.slane %v1336_v2, %v4869_v58 }
 0x476   : > { %v1355_v7 = vpack.i.b16 %v1343_v6, %v1309_v3  ;;  %v1358_v10 = vshrl.u32 %v1343_v6, 16  ;;  %v1371_v14 = vpack.i.b16 %v1350_v11, %v1316_v13  ;;  %v1351_v15 = vcombine.high %v1343_v6, %v4297_v8 }
 0x477   : > { %v1374_v18 = vshrl.u32 %v1350_v11, 16  ;;  %v1352_v21 = vcombine.high %v1350_v11, %v4297_v8 }
 0x478   : > { %1385 = vxpose.xlu0.c.b16.start.end [1/1] (short) (narrow) %v1355_v7, 16  ;;  %v1359_v12 = vpack.i.b16 %v1358_v10, %v1357_v9  ;;  %v1363_v17 = vpack.i.b16 %v1351_v15, %v1317_v16  ;;  %v1366_v24 = vshrl.u32 %v1351_v15, 16 }
 0x479   : > { %v1375_v20 = vpack.i.b16 %v1374_v18, %v1373_v19  ;;  %v1379_v23 = vpack.i.b16 %v1352_v21, %v1318_v22  ;;  %v1382_v27 = vshrl.u32 %v1352_v21, 16 }
 0x47a   : > { %1401 = vxpose.xlu1.c.b16.start.end [1/1] (short) (narrow) %v1359_v12, 16  ;;  %v1367_v26 = vpack.i.b16 %v1366_v24, %v1365_v25 }
 0x47b   : > { %v1383_v29 = vpack.i.b16 %v1382_v27, %v1381_v28 }
 0x47c   : > { %1449 = vxpose.xlu0.c.b16.start.end [1/1] (short) (narrow) %v1371_v14, 16 }
 0x47e   : > { %1139 = vrot.lane.b32.xlu1 %v4900_v38, %s4294_s28  ;;  %s4167_s28 = scalar_lea.vmem %s4166_s21, 256 }
 0x480   : > { %1417 = vxpose.xlu0.c.b16.start.end [1/1] (short) (narrow) %v1363_v17, 16 }
 0x482   : > { %916 = vrot.lane.b32.xlu1 %v4875_v63, %s4298_s16 }
 0x484   : > { %1465 = vxpose.xlu0.c.b16.start.end [1/1] (short) (narrow) %v1375_v20, 16 }
 0x486   : > { %920 = vrot.lane.b32.xlu1 %v4877_v0, %s4298_s16 }
 0x488   : > { %1481 = vxpose.xlu0.c.b16.start.end [1/1] (short) (narrow) %v1379_v23, 16 }
 0x48c   : > { %1433 = vxpose.xlu0.c.b16.start.end [1/1] (short) (narrow) %v1367_v26, 16 }
 0x490   : > { %1497 = vxpose.xlu0.c.b16.start.end [1/1] (short) (narrow) %v1383_v29, 16 }
 0x499   : > { %1137 = vrot.lane.b32.xlu0 %v4900_v38, %s4292_s6  ;;  %s4161_s6 = scalar_lea.vmem %s5083_s11, 128 }
 0x49a   : > { %p4162_p8 = scmp.ne.s32.totalorder %s5083_s11, %s4161_s6  ;;  %p4169_p12 = scmp.lt.s32.totalorder %s4167_s28, %s4161_s6 }
 0x49c   : > { %p4163_p5 = pnand %p4162_p8, %p5220_p11  ;;  %p4170_p2 = por %p4169_p12, %p4168_p1 }
 0x49d   : > { %914 = vrot.lane.b32.xlu0 %v4855_v42, %s4298_s16 }
 0x49e   : > { %p4164_p7 = pneg %p4163_p5 }
 0x4a0   : > { %p4171_p4 = pnand %p4170_p2, %p4164_p7 }
 0x4a1   : > { %918 = vrot.lane.b32.xlu0 %v4867_v57, %s4298_s16 }
 0x4de   : > { %v1393_v63 = vpop.trf.xlu0 }
 0x4e0   : > { %v1409_v37 = vpop.trf.xlu1 }
 0x4e2   : > { %v1457_v30 = vpop.trf.xlu0 }
 0x4e3   : > { %v1513_v34 = vcombine.low %v1393_v63, %v1457_v30 }
 0x4e5   : > { %v1520_v40 = vrot.slane %v1513_v34, %v4865_v55 }
 0x4e6   : > { %v1425_v0 = vpop.trf.xlu0 }
 0x4ea   : > { %v1473_v31 = vpop.trf.xlu0 }
 0x4eb   : > { %v1538_v41 = vcombine.low %v1409_v37, %v1473_v31 }
 0x4ed   : > { %v1545_v57 = vrot.slane %v1538_v41, %v4865_v55 }
 0x4ee   : > { %v1489_v33 = vpop.trf.xlu0 }
 0x4ef   : > { %v1521_v35 = vcombine.low %v1425_v0, %v1489_v33 }
 0x4f0   : > { %v1140_v48 = vpop.permute.xlu1 %1139 }
 0x4f1   : > { %v1528_v36 = vrot.slane %v1521_v35, %v4865_v55 }
 0x4f2   : > { %v1441_v39 = vpop.trf.xlu0 }
 0x4f3   : > { %v1529_v43 = vcombine.low %v1520_v40, %v1528_v36 }
 0x4f4   : > { %v917_v59 = vpop.permute.xlu1 %916 }
 0x4f5   : > { %v1536_v46 = vrot.slane %v1529_v43, %v4869_v58  ;;  %v963_v10 = vrot.slane %v917_v59, %v4865_v55 }
 0x4f6   : > { %v1505_v45 = vpop.trf.xlu0 }
 0x4f7   : > { %v1546_v42 = vcombine.low %v1441_v39, %v1505_v45  ;;  %v1537_v50 = vcombine.high %v1536_v46, %v4297_v8  ;;  %v1566_v52 = vshrl.u32 %v1536_v46, 16 }
 0x4f8   : > { %v921_v6 = vpop.permute.xlu1 %920 }
 0x4f9   : > { %v1553_v47 = vrot.slane %v1546_v42, %v4865_v55  ;;  %v1572_v56 = vshrl.u32 %v1537_v50, 16 }
 0x4fb   : > { %v1554_v44 = vcombine.low %v1545_v57, %v1553_v47 }
 0x4fd   : > { %v1561_v49 = vrot.slane %v1554_v44, %v4869_v58 }
 0x4ff   : > { %v1565_v51 = vpack.i.b16 %v1561_v49, %v1536_v46  ;;  %v1567_v53 = vshrl.u32 %v1561_v49, 16  ;;  %v1562_v54 = vcombine.high %v1561_v49, %v4297_v8 }
 0x501   : > { %v1581_v60 = vsel %vm1579_vm3, %v1565_v51, 0  ;;  %v1568_v61 = vpack.i.b16 %v1567_v53, %v1566_v52  ;;  %v1571_v62 = vpack.i.b16 %v1562_v54, %v1537_v50  ;;  %v1573_v1 = vshrl.u32 %v1562_v54, 16 }
 0x502   : > { %3409 = vmatpush3.bf16.msra.mxu0 %v1581_v60 }
 0x503   : > { %v1627_v2 = vsel %vm1579_vm3, %v1568_v61, 0  ;;  %3420 = vmatprep.subr.bf16.mxu0 %v4290_v5  ;;  %v1574_v3 = vpack.i.b16 %v1573_v1, %v1572_v56  ;;  %v1673_v4 = vsel %vm1579_vm3, %v1571_v62, 0 }
 0x504   : > { %3415 = vmatpush3.bf16.msra.mxu1 %v1627_v2 }
 0x505   : > { %3411 = vmatmul.mubr.msk.bf16.vlgmr.msra.gmra.mrb[0].mxu0 %vm1575_vm4, %v4900_v38  ;;  %3426 = vmatprep.subr.bf16.mxu1 %v4290_v5  ;;  %v1719_v7 = vsel %vm1579_vm3, %v1574_v3, 0  ;;  %v971_v38 = vrot.slane %v921_v6, %v4865_v55 }
 0x506   : > { %3421 = vmatpush3.bf16.msra.mxu0 %v1673_v4  ;;  %3422 = vmatprep.mubr.msk.bf16.mxu0 %vm4291_vm1, %v4290_v5 }
 0x507   : > { %3417 = vmatmul.mubr.msk.bf16.vlgmr.msra.gmra.mrb[8].mxu1 %vm1575_vm4, %v1136_v32  ;;  %3432 = vmatprep.subr.bf16.mxu0 %v4290_v5  ;;  %v972_v11 = vcombine.low %v963_v10, %v971_v38  ;;  %v973_v13 = vcombine.high %v963_v10, %v971_v38 }
 0x508   : > { %3427 = vmatpush3.bf16.msra.mxu1 %v1719_v7  ;;  %3428 = vmatprep.mubr.msk.bf16.mxu1 %vm4291_vm1, %v4290_v5 }
 0x509   : > { %3438 = vmatprep.subr.bf16.mxu1 %v4290_v5  ;;  %v980_v14 = vrot.slane %v972_v11, %v4869_v58  ;;  %v987_v18 = vrot.slane %v973_v13, %v4869_v58 }
 0x50b   : > { %v1138_v9 = vpop.permute.xlu0 %1137  ;;  %v988_v21 = vcombine.high %v980_v14, %v4297_v8  ;;  %v989_v24 = vcombine.high %v987_v18, %v4297_v8  ;;  %v995_v25 = vshrl.u32 %v980_v14, 16  ;;  %v1011_v30 = vshrl.u32 %v987_v18, 16 }
 0x50d   : > { %3423 = vmatmul.mubr.msk.bf16.vlgmr.msra.gmra.mrb[4].mxu0 %vm1575_vm4, %v1138_v9  ;;  %v1003_v63 = vshrl.u32 %v988_v21, 16  ;;  %v1019_v36 = vshrl.u32 %v989_v24, 16 }
 0x50e   : > { %3434 = vmatprep.mubr.msk.bf16.mxu0 %vm4291_vm1, %v4290_v5 }
 0x50f   : > { %v915_v12 = vpop.permute.xlu0 %914  ;;  %3429 = vmatmul.mubr.msk.bf16.vlgmr.msra.gmra.mrb[12].mxu1 %vm1575_vm4, %v1140_v48 }
 0x510   : > { %3440 = vmatprep.mubr.msk.bf16.mxu1 %vm4291_vm1, %v4290_v5  ;;  %v929_v16 = vrot.slane %v915_v12, %v4865_v55 }
 0x513   : > { %v919_v15 = vpop.permute.xlu0 %918 }
 0x514   : > { %v937_v17 = vrot.slane %v919_v15, %v4865_v55 }
 0x516   : > { %v938_v19 = vcombine.low %v929_v16, %v937_v17  ;;  %v939_v20 = vcombine.high %v929_v16, %v937_v17 }
 0x518   : > { %v946_v22 = vrot.slane %v938_v19, %v4869_v58  ;;  %v953_v23 = vrot.slane %v939_v20, %v4869_v58 }
 0x51a   : > { %v954_v26 = vcombine.high %v946_v22, %v4297_v8  ;;  %v955_v27 = vcombine.high %v953_v23, %v4297_v8  ;;  %v992_v28 = vpack.i.b16 %v980_v14, %v946_v22  ;;  %v994_v29 = vshrl.u32 %v946_v22, 16 }
 0x51b   : > { %v1008_v0 = vpack.i.b16 %v987_v18, %v953_v23  ;;  %v1010_v31 = vshrl.u32 %v953_v23, 16 }
 0x51c   : > { %v996_v32 = vpack.i.b16 %v995_v25, %v994_v29  ;;  %v1000_v33 = vpack.i.b16 %v988_v21, %v954_v26  ;;  %v1002_v34 = vshrl.u32 %v954_v26, 16  ;;  %v1016_v35 = vpack.i.b16 %v989_v24, %v955_v27  ;;  %1022 = vst.msk [vmem:[#allocation3] sm:$0x3] %vm905_vm2, %v992_v28 }
 0x51d   : > { %v1012_v37 = vpack.i.b16 %v1011_v30, %v1010_v31  ;;  %v1018_v39 = vshrl.u32 %v955_v27, 16  ;;  %1026 = vst.msk [vmem:[#allocation3 + $0x8] sm:$0x3] %vm905_vm2, %v1008_v0 }
 0x51e   : > { %v1004_v40 = vpack.i.b16 %v1003_v63, %v1002_v34  ;;  %1023 = vst.msk [vmem:[#allocation3 + $0x2] sm:$0x3] %vm905_vm2, %v996_v32  ;;  %1024 = vst.msk [vmem:[#allocation3 + $0x4] sm:$0x3] %vm905_vm2, %v1000_v33 }
 0x51f   : > { %1028 = vst.msk [vmem:[#allocation3 + $0xc] sm:$0x3] %vm905_vm2, %v1016_v35  ;;  %v1020_v41 = vpack.i.b16 %v1019_v36, %v1018_v39  ;;  %1027 = vst.msk [vmem:[#allocation3 + $0xa] sm:$0x3] %vm905_vm2, %v1012_v37 }
 0x520   : > { %1025 = vst.msk [vmem:[#allocation3 + $0x6] sm:$0x3] %vm905_vm2, %v1004_v40 }
 0x521   : > { %1029 = vst.msk [vmem:[#allocation3 + $0xe] sm:$0x3] %vm905_vm2, %v1020_v41 }
 0x523   : > { %v1149_v43 = vld [vmem:[#allocation3] sm:$0x3] }
 0x524   : > { %v1153_v45 = vld [vmem:[#allocation3 + $0x8] sm:$0x3]  ;;  %1801 = vxpose.xlu0.c.b16.start.end [1/1] (short) (narrow) %v1149_v43, 16 }
 0x525   : > { %1865 = vxpose.xlu1.c.b16.start.end [1/1] (short) (narrow) %v1153_v45, 16  ;;  %v1151_v42 = vld [vmem:[#allocation3 + $0x4] sm:$0x3]  ;;  %v1150_v57 = vld [vmem:[#allocation3 + $0x2] sm:$0x3] }
 0x526   : > { %v1154_v46 = vld [vmem:[#allocation3 + $0xa] sm:$0x3]  ;;  %v1155_v47 = vld [vmem:[#allocation3 + $0xc] sm:$0x3] }
 0x527   : > { %v1152_v44 = vld [vmem:[#allocation3 + $0x6] sm:$0x3] }
 0x528   : > { %1833 = vxpose.xlu0.c.b16.start.end [1/1] (short) (narrow) %v1151_v42, 16  ;;  %v1156_v48 = vld [vmem:[#allocation3 + $0xe] sm:$0x3] }
 0x529   : > { %1817 = vxpose.xlu1.c.b16.start.end [1/1] (short) (narrow) %v1150_v57, 16 }
 0x52c   : > { %1881 = vxpose.xlu0.c.b16.start.end [1/1] (short) (narrow) %v1154_v46, 16 }
 0x52d   : > { %1897 = vxpose.xlu1.c.b16.start.end [1/1] (short) (narrow) %v1155_v47, 16 }
 0x530   : > { %1849 = vxpose.xlu0.c.b16.start.end [1/1] (short) (narrow) %v1152_v44, 16 }
 0x534   : > { %1913 = vxpose.xlu0.c.b16.start.end [1/1] (short) (narrow) %v1156_v48, 16 }
 0x58a   : > { %v1809_v49 = vpop.trf.xlu0 }
 0x58b   : > { %v1873_v50 = vpop.trf.xlu1 }
 0x58c   : > { %v1929_v53 = vcombine.low %v1809_v49, %v1873_v50 }
 0x58e   : > { %v1841_v51 = vpop.trf.xlu0  ;;  %v1936_v60 = vrot.slane %v1929_v53, %v4865_v55 }
 0x58f   : > { %v1825_v52 = vpop.trf.xlu1 }
 0x592   : > { %v1889_v54 = vpop.trf.xlu0 }
 0x593   : > { %v1905_v56 = vpop.trf.xlu1  ;;  %v1963_v1 = vcombine.low %v1825_v52, %v1889_v54 }
 0x594   : > { %v1937_v59 = vcombine.low %v1841_v51, %v1905_v56 }
 0x595   : > { %v1970_v6 = vrot.slane %v1963_v1, %v4865_v55 }
 0x596   : > { %v1857_v61 = vpop.trf.xlu0  ;;  %v1944_v62 = vrot.slane %v1937_v59, %v4865_v55 }
 0x598   : > { %v1945_v2 = vcombine.low %v1936_v60, %v1944_v62  ;;  %v1946_v3 = vcombine.high %v1936_v60, %v1944_v62 }
 0x59a   : > { %v1921_v4 = vpop.trf.xlu0  ;;  %v1953_v9 = vrot.slane %v1945_v2, %v4869_v58  ;;  %v1960_v10 = vrot.slane %v1946_v3, %v4869_v58 }
 0x59b   : > { %v1971_v7 = vcombine.low %v1857_v61, %v1921_v4 }
 0x59c   : > { %v1962_v13 = vcombine.high %v1960_v10, %v4297_v8  ;;  %v2001_v15 = vshrl.u32 %v1953_v9, 16  ;;  %v2017_v17 = vshrl.u32 %v1960_v10, 16  ;;  %v1961_v21 = vcombine.high %v1953_v9, %v4297_v8 }
 0x59d   : > { %v1978_v38 = vrot.slane %v1971_v7, %v4865_v55 }
 0x59e   : > { %v2025_v24 = vshrl.u32 %v1962_v13, 16  ;;  %v2009_v63 = vshrl.u32 %v1961_v21, 16 }
 0x59f   : > { %v1979_v11 = vcombine.low %v1970_v6, %v1978_v38  ;;  %v1980_v12 = vcombine.high %v1970_v6, %v1978_v38 }
 0x5a1   : > { %v1987_v14 = vrot.slane %v1979_v11, %v4869_v58  ;;  %v1994_v16 = vrot.slane %v1980_v12, %v4869_v58 }
 0x5a3   : > { %v1999_v18 = vpack.i.b16 %v1987_v14, %v1953_v9  ;;  %v2002_v19 = vshrl.u32 %v1987_v14, 16  ;;  %v2018_v20 = vshrl.u32 %v1994_v16, 16  ;;  %v1995_v22 = vcombine.high %v1987_v14, %v4297_v8 }
 0x5a4   : > { %v1996_v23 = vcombine.high %v1994_v16, %v4297_v8  ;;  %v2015_v26 = vpack.i.b16 %v1994_v16, %v1960_v10 }
 0x5a5   : > { %2029 = vxpose.xlu1.c.b16.start.end [1/1] (short) (narrow) %v1999_v18, 16  ;;  %v2003_v25 = vpack.i.b16 %v2002_v19, %v2001_v15  ;;  %v2019_v29 = vpack.i.b16 %v2018_v20, %v2017_v17  ;;  %v2010_v30 = vshrl.u32 %v1995_v22, 16  ;;  %v2007_v31 = vpack.i.b16 %v1995_v22, %v1961_v21 }
 0x5a6   : > { %v2023_v27 = vpack.i.b16 %v1996_v23, %v1962_v13  ;;  %v2026_v28 = vshrl.u32 %v1996_v23, 16 }
 0x5a7   : > { %2045 = vxpose.xlu0.c.b16.start.end [1/1] (short) (narrow) %v2003_v25, 16  ;;  %v2011_v32 = vpack.i.b16 %v2010_v30, %v2009_v63 }
 0x5a8   : > { %v2027_v0 = vpack.i.b16 %v2026_v28, %v2025_v24 }
 0x5a9   : > { %2093 = vxpose.xlu1.c.b16.start.end [1/1] (short) (narrow) %v2015_v26, 16 }
 0x5ab   : > { %2109 = vxpose.xlu0.c.b16.start.end [1/1] (short) (narrow) %v2019_v29, 16 }
 0x5ad   : > { %2061 = vxpose.xlu1.c.b16.start.end [1/1] (short) (narrow) %v2007_v31, 16 }
 0x5af   : > { %2077 = vxpose.xlu0.c.b16.start.end [1/1] (short) (narrow) %v2011_v32, 16 }
 0x5d8   : > { %v1617_v33 = vpop.f32.mrb[0].mxu0 }
 0x5d9   : > { %v3412_v34 = vpop.f32.mrb[1].mxu0  ;;  %v1761_v35 = vsel %vm1575_vm4, %v1617_v33, -inf }
 0x5da   : > { %v1620_v36 = vpop.f32.mrb[2].mxu0  ;;  %1762 = vmax.xlane.f32.xlu1 %v1761_v35  ;;  %v1663_v37 = vpop.f32.mrb[8].mxu1 }
 0x5db   : > { %v3413_v39 = vpop.f32.mrb[3].mxu0  ;;  %v3418_v40 = vpop.f32.mrb[9].mxu1  ;;  %v1764_v41 = vsel %vm1575_vm4, %v1663_v37, -inf }
 0x5dc   : > { %1765 = vmax.xlane.f32.xlu0 %v1764_v41  ;;  %v1666_v43 = vpop.f32.mrb[10].mxu1 }
 0x5dd   : > { %v3419_v45 = vpop.f32.mrb[11].mxu1 }
 0x5e0   : > { %v1709_v42 = vpop.f32.mrb[4].mxu0 }
 0x5e1   : > { %v3424_v57 = vpop.f32.mrb[5].mxu0  ;;  %v1767_v46 = vsel %vm1575_vm4, %v1709_v42, -inf }
 0x5e2   : > { %v1712_v47 = vpop.f32.mrb[6].mxu0  ;;  %1768 = vmax.xlane.f32.xlu1 %v1767_v46  ;;  %v1755_v44 = vpop.f32.mrb[12].mxu1 }
 0x5e3   : > { %v3425_v48 = vpop.f32.mrb[7].mxu0  ;;  %v3430_v49 = vpop.f32.mrb[13].mxu1  ;;  %v1770_v50 = vsel %vm1575_vm4, %v1755_v44, -inf }
 0x5e4   : > { %1771 = vmax.xlane.f32.xlu0 %v1770_v50  ;;  %v1758_v51 = vpop.f32.mrb[14].mxu1 }
 0x5e5   : > { %v3431_v52 = vpop.f32.mrb[15].mxu1 }
 0x60b   : > { %v2037_v53 = vpop.trf.xlu1 }
 0x60d   : > { %v2053_v54 = vpop.trf.xlu0 }
 0x60f   : > { %2125 = vxpose.xlu1.c.b16.start.end [1/1] (short) (narrow) %v2023_v27, 16  ;;  %v2101_v56 = vpop.trf.xlu1 }
 0x610   : > { %v2157_v12 = vcombine.low %v2037_v53, %v2101_v56 }
 0x611   : > { %2141 = vxpose.xlu0.c.b16.start.end [1/1] (short) (narrow) %v2027_v0, 16  ;;  %v2117_v59 = vpop.trf.xlu0 }
 0x612   : > { %v2182_v16 = vcombine.low %v2053_v54, %v2117_v59  ;;  %v2164_v22 = vrot.slane %v2157_v12, %v4865_v55 }
 0x613   : > { %3700 = vset.pattern.permute.xlu1 %v4297_v8  ;;  %v2069_v60 = vpop.trf.xlu1 }
 0x614   : > { %v2189_v28 = vrot.slane %v2182_v16, %v4865_v55 }
 0x615   : > { %v2085_v61 = vpop.trf.xlu0 }
 0x61a   : > { %3701 = vset.pattern.permute.xlu0 %v4297_v8 }
 0x667   : > { %v1763_v62 = vpop.xlane.xlu1 %1762 }
 0x668   : > { %v1773_v1 = vsub.f32 %v1617_v33, %v1763_v62 }
 0x669   : > { %v1766_v2 = vpop.xlane.xlu0 %1765 }
 0x66a   : > { %v1777_v3 = vmul.f32 1.442695, %v1773_v1  ;;  %v1774_v4 = vsub.f32 %v1663_v37, %v1766_v2 }
 0x66c   : > { %3718 = vpow2.f32 %v1777_v3  ;;  %v1779_v6 = vmul.f32 1.442695, %v1774_v4 }
 0x66e   : > { %3720 = vpow2.f32 %v1779_v6 }
 0x66f   : > { %v1769_v7 = vpop.xlane.xlu1 %1768 }
 0x670   : > { %v1775_v38 = vsub.f32 %v1709_v42, %v1769_v7 }
 0x671   : > { %v1772_v9 = vpop.xlane.xlu0 %1771 }
 0x672   : > { %v1781_v10 = vmul.f32 1.442695, %v1775_v38  ;;  %v1776_v11 = vsub.f32 %v1755_v44, %v1772_v9 }
 0x674   : > { %3722 = vpow2.f32 %v1781_v10  ;;  %v1783_v13 = vmul.f32 1.442695, %v1776_v11 }
 0x675   : > { %v2133_v14 = vpop.trf.xlu1 }
 0x676   : > { %v3719_v15 = vpop.eup %3718  ;;  %3724 = vpow2.f32 %v1783_v13  ;;  %v2165_v17 = vcombine.low %v2069_v60, %v2133_v14 }
 0x677   : > { %v2149_v18 = vpop.trf.xlu0  ;;  %v1785_v19 = vsel %vm1575_vm4, %v3719_v15, 0.0  ;;  %v1797_v20 = vpack.c.bf16 %v3719_v15, %v3719_v15 }
 0x678   : > { %v3721_v21 = vpop.eup %3720  ;;  %v2172_v23 = vrot.slane %v2165_v17, %v4865_v55  ;;  %v2190_v24 = vcombine.low %v2085_v61, %v2149_v18  ;;  %1786 = vadd.xlane.f32.xlu1 %v1785_v19 }
 0x679   : > { %v2223_v25 = vsel %vm1575_vm4, %v1797_v20, 0  ;;  %v1788_v26 = vsel %vm1575_vm4, %v3721_v21, 0.0  ;;  %v1798_v27 = vpack.c.bf16 %v3721_v21, %v3721_v21 }
 0x67a   : > { %v2173_v29 = vcombine.low %v2164_v22, %v2172_v23  ;;  %v2197_v63 = vrot.slane %v2190_v24, %v4865_v55  ;;  %3433 = vmatpush3.bf16.xpose.msra.mxu0 %v2223_v25  ;;  %1789 = vadd.xlane.f32.xlu0 %v1788_v26 }
 0x67b   : > { %v2269_v30 = vsel %vm1575_vm4, %v1798_v27, 0  ;;  %3444 = vmatprep.subr.bf16.mxu0 %v4290_v5 }
 0x67c   : > { %v2180_v0 = vrot.slane %v2173_v29, %v4869_v58  ;;  %v2198_v31 = vcombine.low %v2189_v28, %v2197_v63  ;;  %3439 = vmatpush3.bf16.xpose.msra.mxu1 %v2269_v30 }
 0x67d   : > { %3450 = vmatprep.subr.bf16.mxu1 %v4290_v5 }
 0x67e   : > { %v3723_v32 = vpop.eup %3722  ;;  %v2205_v33 = vrot.slane %v2198_v31, %v4869_v58  ;;  %v2210_v37 = vshrl.u32 %v2180_v0, 16  ;;  %v2181_v47 = vcombine.high %v2180_v0, %v4297_v8 }
 0x67f   : > { %v1791_v34 = vsel %vm1575_vm4, %v3723_v32, 0.0  ;;  %v1799_v35 = vpack.c.bf16 %v3723_v32, %v3723_v32 }
 0x680   : > { %v3725_v36 = vpop.eup %3724  ;;  %v2209_v39 = vpack.i.b16 %v2205_v33, %v2180_v0  ;;  %v2211_v40 = vshrl.u32 %v2205_v33, 16  ;;  %1792 = vadd.xlane.f32.xlu1 %v1791_v34  ;;  %v2206_v42 = vcombine.high %v2205_v33, %v4297_v8  ;;  %v2216_v48 = vshrl.u32 %v2181_v47, 16 }
 0x681   : > { %v1794_v41 = vsel %vm1575_vm4, %v3725_v36, 0.0  ;;  %v2315_v43 = vsel %vm1575_vm4, %v1799_v35, 0  ;;  %v1800_v45 = vpack.c.bf16 %v3725_v36, %v3725_v36 }
 0x682   : > { %1795 = vadd.xlane.f32.xlu0 %v1794_v41  ;;  %3435 = vmatmul.mubr.msk.bf16.vlgmr.msra.gmra.mrb[8].mxu0 %vm1575_vm4, %v2209_v39  ;;  %v2212_v57 = vpack.i.b16 %v2211_v40, %v2210_v37  ;;  %v2217_v44 = vshrl.u32 %v2206_v42, 16  ;;  %v2215_v49 = vpack.i.b16 %v2206_v42, %v2181_v47 }
 0x683   : > { %3445 = vmatpush3.bf16.xpose.msra.mxu0 %v2315_v43  ;;  %v2361_v46 = vsel %vm1575_vm4, %v1800_v45, 0  ;;  %3446 = vmatprep.mubr.msk.bf16.mxu0 %vm4291_vm1, %v4290_v5 }
 0x684   : > { %3441 = vmatmul.mubr.msk.bf16.vlgmr.msra.gmra.mrb[16].mxu1 %vm1575_vm4, %v2212_v57  ;;  %3456 = vmatprep.subr.bf16.mxu0 %v4290_v5  ;;  %v2218_v50 = vpack.i.b16 %v2217_v44, %v2216_v48 }
 0x685   : > { %3451 = vmatpush3.bf16.xpose.msra.mxu1 %v2361_v46  ;;  %3452 = vmatprep.mubr.msk.bf16.mxu1 %vm4291_vm1, %v4290_v5 }
 0x686   : > { %3464 = vmatprep.subr.bf16.mxu1 %v4290_v5 }
 0x68a   : > { %3447 = vmatmul.mubr.msk.bf16.vlgmr.msra.gmra.mrb[12].mxu0 %vm1575_vm4, %v2215_v49 }
 0x68b   : > { %3460 = vmatprep.mubr.msk.bf16.mxu0 %vm4291_vm1, %v4290_v5 }
 0x68c   : > { %3453 = vmatmul.mubr.msk.bf16.vlgmr.msra.gmra.mrb[20].mxu1 %vm1575_vm4, %v2218_v50 }
 0x68d   : > { %3468 = vmatprep.mubr.msk.bf16.mxu1 %vm4291_vm1, %v4290_v5 }
 0x705   : > { %v1787_v8 = vpop.xlane.xlu1 %1786 }
 0x706   : > { %3726 = vrcp.f32 %v1787_v8 }
 0x707   : > { %v1790_v51 = vpop.xlane.xlu0 %1789 }
 0x70d   : > { %v1793_v52 = vpop.xlane.xlu1 %1792 }
 0x70e   : > { %3728 = vrcp.f32 %v1793_v52 }
 0x70f   : > { %3730 = vrcp.f32 %v1790_v51  ;;  %v1796_v53 = vpop.xlane.xlu0 %1795 }
 0x710   : > { %3732 = vrcp.f32 %v1796_v53  ;;  %v3727_v54 = vpop.eup %3726 }
 0x718   : > { %v3729_v56 = vpop.eup %3728 }
 0x719   : > { %v3731_v59 = vpop.eup %3730  ;;  %v2603_v60 = vcombine.low %v3727_v54, %v3729_v56  ;;  %v2604_v6 = vcombine.high %v3727_v54, %v3729_v56 }
 0x71a   : > { %v3733_v61 = vpop.eup %3732 }
 0x71b   : > { %v2619_v62 = vcombine.low %v3731_v59, %v3733_v61  ;;  %v2611_v1 = vrot.slane %v2603_v60, %v4865_v55  ;;  %v2620_v3 = vcombine.high %v3731_v59, %v3733_v61  ;;  %v2618_v11 = vrot.slane %v2604_v6, %v4865_v55 }
 0x71d   : > { %v2627_v2 = vrot.slane %v2619_v62, %v4865_v55  ;;  %v2634_v9 = vrot.slane %v2620_v3, %v4865_v55 }
 0x71f   : > { %v2635_v4 = vcombine.low %v2611_v1, %v2627_v2  ;;  %v2636_v38 = vcombine.high %v2611_v1, %v2627_v2  ;;  %v2651_v13 = vcombine.low %v2618_v11, %v2634_v9  ;;  %v2652_v15 = vcombine.high %v2618_v11, %v2634_v9 }
 0x721   : > { %v2643_v7 = vrot.slane %v2635_v4, %v4869_v58  ;;  %v2650_v12 = vrot.slane %v2636_v38, %v4869_v58  ;;  %v2659_v14 = vrot.slane %v2651_v13, %v4869_v58  ;;  %v2666_v16 = vrot.slane %v2652_v15, %v4869_v58 }
 0x723   : > { %2673 = vperm.xlu1 %3700, %v2643_v7   ;;  %v2667_v10 = vcombine.high %v2643_v7, %v4290_v5  ;;  %v2668_v17 = vcombine.high %v2650_v12, %v4290_v5  ;;  %v2669_v18 = vcombine.high %v2659_v14, %v4290_v5  ;;  %v2670_v19 = vcombine.high %v2666_v16, %v4290_v5  ;;  %v3706_v7 = vld [vmem:[#allocation16] sm:$0xff]  }
 0x724   : > { %3457 = vmatpush3.bf16.msra.mxu0 %v3706_v7 }
 0x725   : > { %2678 = vperm.xlu0 %3701, %v2667_v10   ;;  %3458 = vmatprep.subr.bf16.mxu0 %v4290_v5 }
 0x727   : > { %2683 = vperm.xlu1 %3700, %v2650_v12  }
 0x72b   : > { %2693 = vperm.xlu1 %3700, %v2659_v14  }
 0x72f   : > { %2703 = vperm.xlu1 %3700, %v2666_v16  }
 0x733   : > { %2688 = vperm.xlu1 %3700, %v2668_v17  }
 0x737   : > { %2698 = vperm.xlu1 %3700, %v2669_v18  }
 0x73b   : > { %2708 = vperm.xlu1 %3700, %v2670_v19  }
 0x755   : > { %v2259_v20 = vpop.f32.mrb[8].mxu0 }
 0x756   : > { %v3436_v21 = vpop.f32.mrb[9].mxu0 }
 0x757   : > { %v2262_v22 = vpop.f32.mrb[10].mxu0  ;;  %v2305_v23 = vpop.f32.mrb[16].mxu1 }
 0x758   : > { %v3437_v24 = vpop.f32.mrb[11].mxu0  ;;  %2435 = vxpose.xlu0.b32.start.end [1/1] (short) (narrow) %v2305_v23, 8  ;;  %v3442_v25 = vpop.f32.mrb[17].mxu1 }
 0x759   : > { %v2308_v26 = vpop.f32.mrb[18].mxu1 }
 0x75a   : > { %v3443_v27 = vpop.f32.mrb[19].mxu1 }
 0x75d   : > { %v2351_v28 = vpop.f32.mrb[12].mxu0 }
 0x75e   : > { %v3448_v29 = vpop.f32.mrb[13].mxu0  ;;  %2467 = vxpose.xlu0.b32.start.end [1/1] (short) (narrow) %v2351_v28, 8 }
 0x75f   : > { %v2354_v63 = vpop.f32.mrb[14].mxu0  ;;  %v2397_v30 = vpop.f32.mrb[20].mxu1 }
 0x760   : > { %v3449_v0 = vpop.f32.mrb[15].mxu0  ;;  %v3454_v31 = vpop.f32.mrb[21].mxu1 }
 0x761   : > { %v2400_v32 = vpop.f32.mrb[22].mxu1 }
 0x762   : > { %2499 = vxpose.xlu0.b32.start.end [1/1] (short) (narrow) %v2397_v30, 8  ;;  %v3455_v33 = vpop.f32.mrb[23].mxu1 }
 0x764   : > { %2403 = vxpose.xlu1.b32.start.end [1/1] (short) (narrow) %v2259_v20, 8  ;;  %v3707_v20 = vld [vmem:[#allocation16 + $0x8] sm:$0xff]  }
 0x765   : > { %3459 = vmatpush3.bf16.msra.mxu0 %v3707_v20 }
 0x766   : > { %3472 = vmatprep.subr.bf16.mxu0 %v4290_v5 }
 0x7a2   : > { %v2674_v34 = vpop.permute.xlu1 %2673 }
 0x7a4   : > { %v2679_v39 = vpop.permute.xlu0 %2678 }
 0x7a6   : > { %v2684_v35 = vpop.permute.xlu1 %2683 }
 0x7aa   : > { %v2694_v36 = vpop.permute.xlu1 %2693 }
 0x7ae   : > { %v2704_v37 = vpop.permute.xlu1 %2703 }
 0x7b2   : > { %v2689_v40 = vpop.permute.xlu1 %2688 }
 0x7b6   : > { %v2699_v43 = vpop.permute.xlu1 %2698 }
 0x7ba   : > { %v2709_v42 = vpop.permute.xlu1 %2708 }
 0x7d8   : > { %v2451_v41 = vpop.trf.xlu0 }
 0x7de   : > { %v2483_v45 = vpop.trf.xlu0 }
 0x7e2   : > { %v2515_v57 = vpop.trf.xlu0 }
 0x7e3   : > { %v2547_v46 = vcombine.low %v2451_v41, %v2515_v57  ;;  %v2548_v47 = vcombine.high %v2451_v41, %v2515_v57  ;;  %v3339_v41 = vld [vmem:[#allocation18] ss:$0 sm:$0xff] }
 0x7e4   : > { %v2419_v44 = vpop.trf.xlu1 }
 0x7e5   : > { %v2531_v48 = vcombine.low %v2419_v44, %v2483_v45  ;;  %v2532_v49 = vcombine.high %v2419_v44, %v2483_v45  ;;  %v2555_v50 = vrot.slane %v2547_v46, %v4865_v55  ;;  %v2562_v8 = vrot.slane %v2548_v47, %v4865_v55  ;;  %v3738_v46 = vld [vmem:[#allocation4] sm:$0xff] }
 0x7e7   : > { %v2539_v51 = vrot.slane %v2531_v48, %v4865_v55  ;;  %v2546_v52 = vrot.slane %v2532_v49, %v4865_v55 }
 0x7e9   : > { %v2563_v53 = vcombine.low %v2539_v51, %v2555_v50  ;;  %v2564_v54 = vcombine.high %v2539_v51, %v2555_v50  ;;  %v2579_v56 = vcombine.low %v2546_v52, %v2562_v8  ;;  %v2580_v59 = vcombine.high %v2546_v52, %v2562_v8  ;;  %v3708_v8 = vld [vmem:[#allocation22] sm:$0xff]   ;;  %v3709_v51 = vld [vmem:[#allocation22 + $0x8] sm:$0xff]  }
 0x7ea   : > { %3465 = vmatpush3.bf16.msra.mxu1 %v3708_v8 }
 0x7eb   : > { %v2571_v60 = vrot.slane %v2563_v53, %v4869_v58  ;;  %v2578_v61 = vrot.slane %v2564_v54, %v4869_v58  ;;  %v2587_v62 = vrot.slane %v2579_v56, %v4869_v58  ;;  %v2594_v1 = vrot.slane %v2580_v59, %v4869_v58  ;;  %3466 = vmatprep.subr.bf16.mxu1 %v4290_v5 }
 0x7ed   : > { %v2595_v2 = vcombine.high %v2571_v60, %v4290_v5  ;;  %v2596_v3 = vcombine.high %v2578_v61, %v4290_v5  ;;  %v2597_v4 = vcombine.high %v2587_v62, %v4290_v5  ;;  %v2598_v6 = vcombine.high %v2594_v1, %v4290_v5 }
 0x7ee   : > { %v2711_v38 = vmul.f32 %v2674_v34, %v2571_v60  ;;  %v2713_v9 = vmul.f32 %v2684_v35, %v2578_v61  ;;  %v2715_v10 = vmul.f32 %v2694_v36, %v2587_v62  ;;  %v2717_v11 = vmul.f32 %v2704_v37, %v2594_v1  ;;  %3467 = vmatpush3.bf16.msra.mxu1 %v3709_v51 }
 0x7ef   : > { %v2712_v12 = vmul.f32 %v2679_v39, %v2595_v2  ;;  %v2714_v13 = vmul.f32 %v2689_v40, %v2596_v3  ;;  %v2716_v14 = vmul.f32 %v2699_v43, %v2597_v4  ;;  %v2718_v15 = vmul.f32 %v2709_v42, %v2598_v6  ;;  %v3343_v2 = vld [vmem:[#allocation19] ss:$0 sm:$0xff]  ;;  %v3344_v4 = vld [vmem:[#allocation21] ss:$0 sm:$0xff] }
 0x7f0   : > { %v2719_v16 = vcombine.low %v2711_v38, %v2713_v9  ;;  %v2735_v17 = vcombine.low %v2715_v10, %v2717_v11  ;;  %v3710_v9 = vld [vmem:[#allocation25] sm:$0xff]   ;;  %v3711_v10 = vld [vmem:[#allocation25 + $0x8] sm:$0xff]   ;;  %v3712_v11 = vld [vmem:[#allocation25 + $0x10] sm:$0xff]  }
 0x7f1   : > { %v2727_v18 = vcombine.low %v2712_v12, %v2714_v13  ;;  %v2743_v19 = vcombine.low %v2716_v14, %v2718_v15  ;;  %v3713_v12 = vld [vmem:[#allocation25 + $0x18] sm:$0xff]  }
 0x7f2   : > { %v2726_v21 = vrot.slane %v2719_v16, %v4865_v55  ;;  %v2742_v23 = vrot.slane %v2735_v17, %v4865_v55  ;;  %v3345_v13 = vld [vmem:[#allocation24] ss:$0 sm:$0xff] }
 0x7f3   : > { %v2734_v22 = vrot.slane %v2727_v18, %v4865_v55  ;;  %v2750_v24 = vrot.slane %v2743_v19, %v4865_v55 }
 0x7f5   : > { %v2752_v25 = vcombine.high %v2726_v21, %v2734_v22  ;;  %v2768_v26 = vcombine.high %v2742_v23, %v2750_v24  ;;  %v2751_v27 = vcombine.low %v2726_v21, %v2734_v22  ;;  %v2767_v28 = vcombine.low %v2742_v23, %v2750_v24 }
 0x7f7   : > { %v2766_v29 = vrot.slane %v2752_v25, %v4869_v58  ;;  %v2782_v63 = vrot.slane %v2768_v26, %v4869_v58  ;;  %v2759_v30 = vrot.slane %v2751_v27, %v4869_v58  ;;  %v2775_v0 = vrot.slane %v2767_v28, %v4869_v58  ;;  %v3349_v28 = vld [vmem:[#allocation27] ss:$0 sm:$0xff] }
 0x7f9   : > { %v2785_v31 = vcombine.low %v2766_v29, %v2782_v63  ;;  %v2784_v32 = vcombine.high %v2759_v30, %v2775_v0  ;;  %v2783_v33 = vcombine.low %v2759_v30, %v2775_v0  ;;  %v2786_v55 = vcombine.high %v2766_v29, %v2782_v63 }
 0x7fb   : > { %2792 = vrot.lane.b32.xlu0 %v2785_v31, %s4299_s26  ;;  %2788 = vrot.lane.b32.xlu1 %v2784_v32, %s4300_s5 }
 0x7ff   : > { %2796 = vrot.lane.b32.xlu1 %v2786_v55, %s4301_s13 }
 0x86d   : > { %v2789_v34 = vpop.permute.xlu1 %2788  ;;  %v2793_v35 = vpop.permute.xlu0 %2792 }
 0x86e   : > { %v2799_v36 = vsel %vm1575_vm4, %v2783_v33, %v2789_v34 }
 0x86f   : > { %v2801_v39 = vsel %vm2800_vm5, %v2799_v36, %v2793_v35 }
 0x871   : > { %v2797_v37 = vpop.permute.xlu1 %2796 }
 0x872   : > { %v2803_v40 = vsel %vm2802_vm6, %v2801_v39, %v2797_v37 }
 0x873   : > { %v2804_v58 = vpack.c.bf16 %v2803_v40, %v2803_v40 }
 0x875   : > { %3461 = vmatmul.mubr.msk.bf16.vlgmr.msra.gmra.mrb[16].mxu0 %vm700_vm0, %v2804_v58 }
 0x876   : > { %3480 = vmatprep.mubr.msk.bf16.mxu0 %vm4291_vm1, %v4290_v5  ;;  %3473 = vmatpush3.bf16.msra.mxu0 %v3710_v9 }
 0x877   : > { %3474 = vmatprep.subr.bf16.mxu0 %v4290_v5 }
 0x87a   : > { %3475 = vmatpush3.bf16.msra.mxu0 %v3711_v10 }
 0x87b   : > { %3476 = vmatprep.subr.bf16.mxu0 %v4290_v5 }
 0x87e   : > { %3477 = vmatpush3.bf16.msra.mxu0 %v3712_v11 }
 0x87f   : > { %3478 = vmatprep.subr.bf16.mxu0 %v4290_v5 }
 0x882   : > { %3479 = vmatpush3.bf16.msra.mxu0 %v3713_v12 }
 0x948   : > { %v2865_v43 = vpop.f32.mrb[16].mxu0 }
 0x949   : > { %v2866_v45 = vadd.f32 %v3339_v41, %v2865_v43  ;;  %v3462_v42 = vpop.f32.mrb[17].mxu0 }
 0x94a   : > { %v2868_v57 = vpop.f32.mrb[18].mxu0 }
 0x94b   : > { %v5061_v47 = vadd.f32 %v3738_v46, %v2866_v45  ;;  %v3463_v44 = vpop.f32.mrb[19].mxu0 }
 0x94d   : > { %v2874_v48 = vsel %vm700_vm0, %v5061_v47, 0.0  ;;  %v2878_v49 = vmul.f32 %v5061_v47, %v5061_v47 }
 0x94e   : > { %2875 = vadd.xlane.f32.xlu1 %v2874_v48 }
 0x94f   : > { %v2879_v50 = vsel %vm700_vm0, %v2878_v49, 0.0 }
 0x950   : > { %2880 = vadd.xlane.f32.xlu0 %v2879_v50 }
 0x9db   : > { %v2876_v52 = vpop.xlane.xlu1 %2875 }
 0x9dc   : > { %v2877_v53 = vmul.f32 0.03125, %v2876_v52 }
 0x9dd   : > { %v2881_v54 = vpop.xlane.xlu0 %2880 }
 0x9de   : > { %v2883_v56 = vmul.f32 %v2877_v53, %v2877_v53  ;;  %v2882_v59 = vmul.f32 0.03125, %v2881_v54  ;;  %v2885_v62 = vsub.f32 %v5061_v47, %v2877_v53 }
 0x9e0   : > { %v2884_v60 = vsub.f32 %v2882_v59, %v2883_v56 }
 0x9e2   : > { %v2886_v61 = vadd.f32 1e-06, %v2884_v60 }
 0x9e4   : > { %3734 = vrsqrt.f32 %v2886_v61 }
 0x9ee   : > { %v3735_v1 = vpop.eup %3734 }
 0x9ef   : > { %v2888_v3 = vmul.f32 %v3735_v1, %v2885_v62 }
 0x9f1   : > { %v2895_v6 = vmul.f32 %v3343_v2, %v2888_v3 }
 0x9f3   : > { %v2902_v7 = vadd.f32 %v3344_v4, %v2895_v6 }
 0x9f5   : > { %v2903_v38 = vpack.c.bf16 %v2902_v7, %v2902_v7 }
 0x9f7   : > { %3469 = vmatmul.mubr.msk.bf16.vlgmr.msra.gmra.mrb[24].mxu1 %vm700_vm0, %v2903_v38 }
 0xaca   : > { %v2964_v14 = vpop.f32.mrb[24].mxu1 }
 0xacb   : > { %v2965_v15 = vadd.f32 %v3345_v13, %v2964_v14  ;;  %v3470_v16 = vpop.f32.mrb[25].mxu1 }
 0xacc   : > { %v2967_v17 = vpop.f32.mrb[26].mxu1 }
 0xacd   : > { %v2971_v18 = vmul.f32 0.044715, %v2965_v15  ;;  %v3471_v19 = vpop.f32.mrb[27].mxu1  ;;  %v2970_v25 = vmul.f32 0.5, %v2965_v15 }
 0xacf   : > { %v2972_v20 = vmul.f32 %v2971_v18, %v2965_v15 }
 0xad1   : > { %v2973_v21 = vmul.f32 %v2972_v20, %v2965_v15 }
 0xad3   : > { %v2974_v22 = vadd.f32 %v2973_v21, %v2965_v15 }
 0xad5   : > { %v2975_v23 = vmul.f32 0.7978846, %v2974_v22 }
 0xad7   : > { %3736 = vtanh.f32 %v2975_v23 }
 0xae1   : > { %v3737_v24 = vpop.eup %3736 }
 0xae2   : > { %v2977_v26 = vadd.f32 1.0, %v3737_v24 }
 0xae4   : > { %v2978_v27 = vmul.f32 %v2977_v26, %v2970_v25 }
 0xae6   : > { %v2979_v5 = vpack.c.bf16 %v2978_v27, %v2978_v27 }
 0xae8   : > { %3481 = vmatmul.mubr.msk.bf16.vlgmr.msra.gmra.mrb[20].mxu0 %vm3019_vm7, %v2979_v5 }
 0xbbb   : > { %v3057_v29 = vpop.f32.mrb[20].mxu0 }
 0xbbc   : > { %v3058_v63 = vadd.f32 %v3349_v28, %v3057_v29  ;;  %v3482_v30 = vpop.f32.mrb[21].mxu0 }
 0xbbd   : > { %v3060_v0 = vpop.f32.mrb[22].mxu0 }
 0xbbe   : > { %v3063_v31 = vadd.f32 %v3058_v63, %v5061_v47  ;;  %v3483_v32 = vpop.f32.mrb[23].mxu0 }
 0xbc0   : > { %3064 = vst.msk [vmem:[%s691_s30] sm:$0xff] %vm700_vm0, %v3063_v31 }
 0xbc1   : > { %4174 = shalt.err (!%p4171_p4)
}
 0xbc2   : > { %s4175_s16 = scalar_lea.hbm %s5081_s7, 128  ;;  %s4179_s13 = scalar_lea.hbm %s5219_s2, 256 }
 0xbc3   : > { %p4176_p3 = scmp.ne.s32.totalorder %s5081_s7, %s4175_s16  ;;  %p4180_p0 = scmp.lt.u32.totalorder %s5081_s7, %s5219_s2 }
 0xbc4   : > { %p4181_p10 = scmp.lt.u32.totalorder %s4179_s13, %s4175_s16  ;;  %p4183_p8 = scmp.lt.u32.totalorder %s4175_s16, %s5081_s7 }
 0xbc5   : > { %p4177_p13 = pnand %p4176_p3, %p5220_p11 }
 0xbc6   : > { %p4182_p9 = por %p4181_p10, %p4180_p0 }
 0xbc7   : > { %p4178_p6 = pneg %p4177_p13 }
 0xbc8   : > { %p4184_p5 = por %p4183_p8, %p4182_p9 }
 0xbca   : > { %p4185_p7 = pnand %p4184_p5, %p4178_p6 }
 0xbcc   : > { %4188 = shalt.err (!%p4185_p7)
}
 0xbcd   : > { %3542 = dma.vmem_to_hbm [thread:$0]  (%p5220_p11), %s5083_s11, 128, %s5081_s7, %s3066_s14  }
 0xbce PF: > { %p3622_p1 = scmp.ge.s32.totalorder %s4271_s23, 2  ;;  %s3092_s30 = sand.u32 1, %s4251_s18  }
 0xbcf   : > { %p5221_p12 = scmp.ne.s32.totalorder %s5201_s29, 0  ;;  %s3093_s9 = scalar_lea.sflag [#allocation6], %s3092_s30 }
 0xbd1   : > { %p3591_p2 = pnand %p3622_p1, %p5221_p12 }
 0xbd3   : > { %4246 = dma.done.wait (!%p3591_p2), %s3093_s9, 128  }
 0xbd4   : > { %4248 = vsyncadd (!%p3591_p2), %s3093_s9, 4294967168  ;;  %s36_s23 = sadd.s32 1, %s4271_s23   ;;  %s5222_s18 = smov %s4255_s19 }
 0xbd5   : > { %p33_p4 = scmp.ge.s32.totalorder %s36_s23, 4   ;;  %s5223_s19 = smov %s4259_s20 }
 0xbd6   : > { %s5224_s20 = smov %s4638_s25  ;;  %s5225_s21 = smov %s4267_s22 }
 0xbd7   : > { %s5226_s22 = smov %s5228_s12  ;;  %35 = sbr.rel (!%p33_p4) target bundleno = 29 (0x1d), region = 179 }
 0xbde   :  { %3098 = vsyncpa [#allocation5], 1 }
 0xbdf   :  { %3100 = vsyncpa [#allocation5 + $0x1], 1 }
 0xbe0   :  { %3101 = vsyncpa [#allocation8], 1 }
 0xbe1   :  { %3102 = vsyncpa [#allocation11], 1 }
 0xbe2   :  { %3103 = vsyncpa [#allocation14], 1 }
 0xbe3   :  { %3104 = vsyncpa [#allocation17], 1 }
 0xbe4   :  { %3105 = vsyncpa [#allocation20], 1 }
 0xbe5   :  { %3106 = vsyncpa [#allocation23], 1 }
 0xbe6   :  { %3107 = vsyncpa [#allocation26], 1 }
 0xbe7   :  { %3108 = vsyncpa [#allocation6], 1 }
 0xbe8   :  { %3110 = vsyncpa [#allocation6 + $0x1], 1 }

</bundles_post_ra>
